<compile_context>
chip_gen: v5e
topology: v5e:2x2
jax: 0.10.0
libtpu: 0.0.40
codegen_flags: <defaults>
</compile_context>

<pallas_src>
import functools

import jax
import jax.numpy as jnp
from jax.experimental import pallas as pl
from jax.experimental.pallas import tpu as pltpu


# --------------------------------------------------------------------------
# Kernel
# --------------------------------------------------------------------------
def combined_kernel(x_ref,
                    w1_ref, w2_ref, w3_ref, w4_ref,   # bf16 weights (w2/w3 lane-padded)
                    bias_ref,                         # packed f32 biases (1, BW)
                    stroke_ref, traj_ref,
                    *, H, TDP, SD, offs):
    o1, o2, o3, o4 = offs
    bf16 = jnp.bfloat16

    x = x_ref[...].astype(bf16)                                      # (TM, L)

    b1 = bias_ref[:, o1:o1 + H]
    b2 = bias_ref[:, o2:o2 + TDP]
    b3 = bias_ref[:, o3:o3 + H]
    b4 = bias_ref[:, o4:o4 + SD]

    # ---- traj_vae.decode: latent -> hidden -> traj (tanh) ----
    h1 = jnp.dot(x, w1_ref[...], preferred_element_type=jnp.float32) + b1
    h1 = jnp.maximum(h1, 0.0)                                        # ReLU
    traj = jnp.tanh(
        jnp.dot(h1.astype(bf16), w2_ref[...],
                preferred_element_type=jnp.float32) + b2
    )                                                                # (TM, TDP), cols >= TD are 0

    # ---- traj_to_stroke: traj -> hidden -> stroke (sigmoid) ----
    h2 = jnp.dot(traj.astype(bf16), w3_ref[...],
                 preferred_element_type=jnp.float32) + b3
    h2 = jnp.maximum(h2, 0.0)                                        # ReLU
    logits = jnp.dot(h2.astype(bf16), w4_ref[...],
                     preferred_element_type=jnp.float32) + b4
    stroke = 0.5 * jnp.tanh(0.5 * logits) + 0.5                      # sigmoid via tanh (EUP only)

    traj_ref[...] = traj.astype(traj_ref.dtype)
    stroke_ref[...] = stroke.astype(stroke_ref.dtype)


# --------------------------------------------------------------------------
# One-time parameter preparation (hoisted out of the hot path)
# --------------------------------------------------------------------------
def _round_up(n, m):
    return ((n + m - 1) // m) * m


def prepare_params(params):
    """Cast weights to bf16, pad trajectory head to 128 lanes, pack biases."""
    w1, b1, w2, b2, w3, b3, w4, b4 = params
    L, H = w1.shape
    TD = w2.shape[1]                       # seq_len * 2
    SD = w4.shape[1]                       # img_hw * img_hw
    TDP = _round_up(max(128, TD), 128)     # lane-dense trajectory width

    bf16 = jnp.bfloat16
    w1c = w1.astype(bf16)
    # Zero-pad traj head / following input weight to TDP lanes: exact
    # (tanh(0)=0 and zero rows contribute nothing).
    w2p = jnp.zeros((H, TDP), bf16).at[:, :TD].set(w2.astype(bf16))
    w3p = jnp.zeros((TDP, H), bf16).at[:TD, :].set(w3.astype(bf16))
    w4c = w4.astype(bf16)

    # Pack biases at 128-lane-aligned slots -> one input DMA instead of four.
    o1 = 0
    o2 = o1 + _round_up(H, 128)
    o3 = o2 + _round_up(TDP, 128)
    o4 = o3 + _round_up(H, 128)
    BW = o4 + _round_up(SD, 128)
    bias = jnp.zeros((1, BW), jnp.float32)
    bias = bias.at[:, o1:o1 + H].set(b1)
    bias = bias.at[:, o2:o2 + TD].set(b2)
    bias = bias.at[:, o3:o3 + H].set(b3)
    bias = bias.at[:, o4:o4 + SD].set(b4)

    meta = dict(L=L, H=H, TD=TD, SD=SD, TDP=TDP, BW=BW,
                bias_offsets=(o1, o2, o3, o4))
    return (w1c, w2p, w3p, w4c, bias), meta


def _grid_steps_for_device():
    """One step per TensorCore: 2 on dual-TC chips (v4/v5p/v7x), else 1."""
    try:
        kind = jax.devices()[0].device_kind.lower()
    except Exception:
        return 1
    if any(tag in kind for tag in ("v7", "7x", "v4", "v5p")):
        return 2
    return 1


# --------------------------------------------------------------------------
# Forward wrapper (hot path: a single pallas_call + reshape/slice)
# --------------------------------------------------------------------------
def combined_forward(x, prepped, meta, *, seq_len, img_hw):
    """x: (B, latent_dim) f32.  Returns (stroke NCHW (B,1,H,W), traj (B, seq_len, 2)), bf16."""
    B, L = x.shape
    w1c, w2p, w3p, w4c, bias = prepped
    H, TD, SD, TDP, BW = meta["H"], meta["TD"], meta["SD"], meta["TDP"], meta["BW"]
    offs = meta["bias_offsets"]

    # Batch tiling: as few, as large grid steps as possible (per-step overhead
    # dominates at this size); on dual-TC chips use exactly one step per core.
    n_steps = max(1, min(_grid_steps_for_device(), pl.cdiv(B, 8)))
    TM = min(_round_up(pl.cdiv(B, n_steps), 8), 1024)
    TM = min(TM, B) if B % 8 != 0 else TM
    nb = pl.cdiv(B, TM)

    resident = lambda shape: pl.BlockSpec(shape, lambda i: tuple(0 for _ in shape))
    batched = lambda shape: pl.BlockSpec(shape, lambda i: (i,) + tuple(0 for _ in shape[1:]))

    grid_spec = pltpu.PrefetchScalarGridSpec(
        num_scalar_prefetch=0,
        grid=(nb,),
        in_specs=[
            batched((TM, L)),                      # x tile (pipelined)
            resident((L, H)),                      # w1   (VMEM-resident)
            resident((H, TDP)),                    # w2 (lane-padded)
            resident((TDP, H)),                    # w3 (row-padded)
            resident((H, SD)),                     # w4
            resident((1, BW)),                     # packed biases
        ],
        out_specs=(batched((TM, SD)), batched((TM, TDP))),
    )

    kernel = functools.partial(combined_kernel, H=H, TDP=TDP, SD=SD, offs=offs)

    stroke_flat, traj_pad = pl.pallas_call(
        kernel,
        out_shape=(
            jax.ShapeDtypeStruct((B, SD), jnp.bfloat16),     # bf16 writeback (dominant HBM traffic)
            jax.ShapeDtypeStruct((B, TDP), jnp.bfloat16),
        ),
        grid_spec=grid_spec,
        compiler_params=pltpu.CompilerParams(
            dimension_semantics=("parallel",),               # megacore sharding on dual-TC chips
            vmem_limit_bytes=32 * 1024 * 1024,
        ),
    )(x, w1c, w2p, w3p, w4c, bias)

    stroke = stroke_flat.reshape(B, 1, img_hw, img_hw)       # NCHW, bf16
    traj = traj_pad[:, :TD].reshape(B, seq_len, 2)           # bf16
    return stroke, traj


# --------------------------------------------------------------------------
# Synthetic parameters + pure-JAX reference
# --------------------------------------------------------------------------
def make_params(key, latent_dim, hidden, seq_len, img_hw):
    TD = seq_len * 2
    SD = img_hw * img_hw
    ks = jax.random.split(key, 8)
    init = lambda k, shape, fan_in: (jax.random.normal(k, shape, jnp.float32)
                                     / jnp.sqrt(jnp.float32(fan_in)))
    w1 = init(ks[0], (latent_dim, hidden), latent_dim)
    b1 = init(ks[1], (1, hidden), hidden)
    w2 = init(ks[2], (hidden, TD), hidden)
    b2 = init(ks[3], (1, TD), TD)
    w3 = init(ks[4], (TD, hidden), TD)
    b3 = init(ks[5], (1, hidden), hidden)
    w4 = init(ks[6], (hidden, SD), hidden)
    b4 = init(ks[7], (1, SD), SD)
    return (w1, b1, w2, b2, w3, b3, w4, b4)


def reference_forward(x, params):
    """Pure-JAX reference mirroring the kernel's bf16-MXU / f32-accumulate path."""
    w1, b1, w2, b2, w3, b3, w4, b4 = params
    bf16 = jnp.bfloat16
    dot = lambda a, b: jnp.dot(a.astype(bf16), b.astype(bf16),
                               preferred_element_type=jnp.float32)
    h1 = jnp.maximum(dot(x, w1) + b1, 0.0)
    traj = jnp.tanh(dot(h1, w2) + b2)
    h2 = jnp.maximum(dot(traj, w3) + b3, 0.0)
    stroke = jax.nn.sigmoid(dot(h2, w4) + b4)
    return stroke, traj


if __name__ == "__main__":
    B, LATENT, HIDDEN, SEQ, HW = 256, 8, 32, 8, 16

    key = jax.random.PRNGKey(0)
    kx, kp = jax.random.split(key)
    x = jax.random.normal(kx, (B, LATENT), jnp.float32)      # latent codes
    params = make_params(kp, LATENT, HIDDEN, SEQ, HW)

    # One-time preparation (not in the hot path).
    prepped, meta = prepare_params(params)
    prepped = jax.block_until_ready(prepped)

    fwd = jax.jit(lambda xx, pp: combined_forward(xx, pp, meta, seq_len=SEQ, img_hw=HW))
    stroke, traj = fwd(x, prepped)
    jax.block_until_ready((stroke, traj))

    stroke_ref, traj_ref = reference_forward(x, params)
    traj_err = jnp.max(jnp.abs(traj.astype(jnp.float32) - traj_ref.reshape(B, SEQ, 2)))
    stroke_err = jnp.max(jnp.abs(stroke.astype(jnp.float32) - stroke_ref.reshape(B, 1, HW, HW)))
    assert traj_err < 3e-2, float(traj_err)
    assert stroke_err < 3e-2, float(stroke_err)

    print("KERNEL_OK")
</pallas_src>

<mosaic_0001>
module attributes {stable_mosaic.version = 11 : i64} {
  func.func @combined_kernel(%arg0: i32, %arg1: memref<256x8xf32, #tpu.memory_space<vmem>>, %arg2: memref<8x32xbf16, #tpu.memory_space<vmem>>, %arg3: memref<32x128xbf16, #tpu.memory_space<vmem>>, %arg4: memref<128x32xbf16, #tpu.memory_space<vmem>>, %arg5: memref<32x256xbf16, #tpu.memory_space<vmem>>, %arg6: memref<1x640xf32, #tpu.memory_space<vmem>>, %arg7: memref<256x256xbf16, #tpu.memory_space<vmem>>, %arg8: memref<256x128xbf16, #tpu.memory_space<vmem>>) attributes {dimension_semantics = [#tpu.dimension_semantics<parallel>], iteration_bounds = array<i64: 1>, scalar_prefetch = 0 : i64, scratch_operands = 0 : i64, tpu.core_type = #tpu.core_type<tc>, window_params = [{transform_indices = @transform_0, window_bounds = array<i64: 256, 8>}, {pipeline_mode = #tpu.pipeline_mode<synchronous>, transform_indices = @transform_1, window_bounds = array<i64: 8, 32>}, {pipeline_mode = #tpu.pipeline_mode<synchronous>, transform_indices = @transform_2, window_bounds = array<i64: 32, 128>}, {pipeline_mode = #tpu.pipeline_mode<synchronous>, transform_indices = @transform_3, window_bounds = array<i64: 128, 32>}, {pipeline_mode = #tpu.pipeline_mode<synchronous>, transform_indices = @transform_4, window_bounds = array<i64: 32, 256>}, {pipeline_mode = #tpu.pipeline_mode<synchronous>, transform_indices = @transform_5, window_bounds = array<i64: 1, 640>}, {transform_indices = @transform_6, window_bounds = array<i64: 256, 256>}, {transform_indices = @transform_7, window_bounds = array<i64: 256, 128>}]} {
    %c0 = arith.constant 0 : index
    %c0_0 = arith.constant 0 : index
    %0 = vector.load %arg1[%c0, %c0_0] : memref<256x8xf32, #tpu.memory_space<vmem>>, vector<256x8xf32>
    %1 = arith.truncf %0 : vector<256x8xf32> to vector<256x8xbf16>
    %c0_1 = arith.constant 0 : index
    %c0_2 = arith.constant 0 : index
    %2 = vector.load %arg6[%c0_1, %c0_2] : memref<1x640xf32, #tpu.memory_space<vmem>>, vector<1x32xf32>
    %c0_3 = arith.constant 0 : index
    %c128 = arith.constant 128 : index
    %3 = vector.load %arg6[%c0_3, %c128] : memref<1x640xf32, #tpu.memory_space<vmem>>, vector<1x128xf32>
    %c0_4 = arith.constant 0 : index
    %c256 = arith.constant 256 : index
    %4 = vector.load %arg6[%c0_4, %c256] : memref<1x640xf32, #tpu.memory_space<vmem>>, vector<1x32xf32>
    %c0_5 = arith.constant 0 : index
    %c384 = arith.constant 384 : index
    %5 = vector.load %arg6[%c0_5, %c384] : memref<1x640xf32, #tpu.memory_space<vmem>>, vector<1x256xf32>
    %c0_6 = arith.constant 0 : index
    %c0_7 = arith.constant 0 : index
    %6 = vector.load %arg2[%c0_6, %c0_7] : memref<8x32xbf16, #tpu.memory_space<vmem>>, vector<8x32xbf16>
    %cst = arith.constant dense<0.000000e+00> : vector<256x32xf32>
    %7 = tpu.matmul %1, %6, %cst {dimension_numbers = #tpu.dot_dimension_numbers<[1], [0], [0], [1], [0, 0, 1, 1], [], []>} : vector<256x8xbf16>, vector<8x32xbf16>, vector<256x32xf32> -> vector<256x32xf32>
    %8 = vector.broadcast %2 : vector<1x32xf32> to vector<256x32xf32>
    %9 = arith.addf %7, %8 : vector<256x32xf32>
    %cst_8 = arith.constant 0.000000e+00 : f32
    %10 = vector.broadcast %cst_8 : f32 to vector<256x32xf32>
    %11 = arith.maximumf %9, %10 : vector<256x32xf32>
    %12 = arith.truncf %11 : vector<256x32xf32> to vector<256x32xbf16>
    %c0_9 = arith.constant 0 : index
    %c0_10 = arith.constant 0 : index
    %13 = vector.load %arg3[%c0_9, %c0_10] : memref<32x128xbf16, #tpu.memory_space<vmem>>, vector<32x128xbf16>
    %cst_11 = arith.constant dense<0.000000e+00> : vector<256x128xf32>
    %14 = tpu.matmul %12, %13, %cst_11 {dimension_numbers = #tpu.dot_dimension_numbers<[1], [0], [0], [1], [0, 0, 1, 1], [], []>} : vector<256x32xbf16>, vector<32x128xbf16>, vector<256x128xf32> -> vector<256x128xf32>
    %15 = vector.broadcast %3 : vector<1x128xf32> to vector<256x128xf32>
    %16 = arith.addf %14, %15 : vector<256x128xf32>
    %17 = math.tanh %16 : vector<256x128xf32>
    %18 = arith.truncf %17 : vector<256x128xf32> to vector<256x128xbf16>
    %c0_12 = arith.constant 0 : index
    %c0_13 = arith.constant 0 : index
    %19 = vector.load %arg4[%c0_12, %c0_13] : memref<128x32xbf16, #tpu.memory_space<vmem>>, vector<128x32xbf16>
    %cst_14 = arith.constant dense<0.000000e+00> : vector<256x32xf32>
    %20 = tpu.matmul %18, %19, %cst_14 {dimension_numbers = #tpu.dot_dimension_numbers<[1], [0], [0], [1], [0, 0, 1, 1], [], []>} : vector<256x128xbf16>, vector<128x32xbf16>, vector<256x32xf32> -> vector<256x32xf32>
    %21 = vector.broadcast %4 : vector<1x32xf32> to vector<256x32xf32>
    %22 = arith.addf %20, %21 : vector<256x32xf32>
    %cst_15 = arith.constant 0.000000e+00 : f32
    %23 = vector.broadcast %cst_15 : f32 to vector<256x32xf32>
    %24 = arith.maximumf %22, %23 : vector<256x32xf32>
    %25 = arith.truncf %24 : vector<256x32xf32> to vector<256x32xbf16>
    %c0_16 = arith.constant 0 : index
    %c0_17 = arith.constant 0 : index
    %26 = vector.load %arg5[%c0_16, %c0_17] : memref<32x256xbf16, #tpu.memory_space<vmem>>, vector<32x256xbf16>
    %cst_18 = arith.constant dense<0.000000e+00> : vector<256x256xf32>
    %27 = tpu.matmul %25, %26, %cst_18 {dimension_numbers = #tpu.dot_dimension_numbers<[1], [0], [0], [1], [0, 0, 1, 1], [], []>} : vector<256x32xbf16>, vector<32x256xbf16>, vector<256x256xf32> -> vector<256x256xf32>
    %28 = vector.broadcast %5 : vector<1x256xf32> to vector<256x256xf32>
    %29 = arith.addf %27, %28 : vector<256x256xf32>
    %cst_19 = arith.constant 5.000000e-01 : f32
    %30 = vector.broadcast %cst_19 : f32 to vector<256x256xf32>
    %31 = arith.mulf %30, %29 : vector<256x256xf32>
    %32 = math.tanh %31 : vector<256x256xf32>
    %cst_20 = arith.constant 5.000000e-01 : f32
    %33 = vector.broadcast %cst_20 : f32 to vector<256x256xf32>
    %34 = arith.mulf %33, %32 : vector<256x256xf32>
    %cst_21 = arith.constant 5.000000e-01 : f32
    %35 = vector.broadcast %cst_21 : f32 to vector<256x256xf32>
    %36 = arith.addf %34, %35 : vector<256x256xf32>
    %37 = arith.truncf %17 : vector<256x128xf32> to vector<256x128xbf16>
    %c0_22 = arith.constant 0 : index
    %c0_23 = arith.constant 0 : index
    %38 = vector.load %arg8[%c0_22, %c0_23] : memref<256x128xbf16, #tpu.memory_space<vmem>>, vector<256x128xbf16>
    tpu.vector_store %arg8[%c0_22, %c0_23], %37 {strides = array<i32>} : memref<256x128xbf16, #tpu.memory_space<vmem>>, vector<256x128xbf16>,
    %39 = arith.truncf %36 : vector<256x256xf32> to vector<256x256xbf16>
    %c0_24 = arith.constant 0 : index
    %c0_25 = arith.constant 0 : index
    %40 = vector.load %arg7[%c0_24, %c0_25] : memref<256x256xbf16, #tpu.memory_space<vmem>>, vector<256x256xbf16>
    tpu.vector_store %arg7[%c0_24, %c0_25], %39 {strides = array<i32>} : memref<256x256xbf16, #tpu.memory_space<vmem>>, vector<256x256xbf16>,
    return
  }
  func.func @transform_0(%arg0: i32) -> (i32, i32) {
    %c0_i32 = arith.constant 0 : i32
    %c0_i32_0 = arith.constant 0 : i32
    return %arg0, %c0_i32 : i32, i32
  }
  func.func @transform_1(%arg0: i32) -> (i32, i32) {
    %c0_i32 = arith.constant 0 : i32
    %c0_i32_0 = arith.constant 0 : i32
    %c0_i32_1 = arith.constant 0 : i32
    return %c0_i32, %c0_i32_0 : i32, i32
  }
  func.func @transform_2(%arg0: i32) -> (i32, i32) {
    %c0_i32 = arith.constant 0 : i32
    %c0_i32_0 = arith.constant 0 : i32
    %c0_i32_1 = arith.constant 0 : i32
    return %c0_i32, %c0_i32_0 : i32, i32
  }
  func.func @transform_3(%arg0: i32) -> (i32, i32) {
    %c0_i32 = arith.constant 0 : i32
    %c0_i32_0 = arith.constant 0 : i32
    %c0_i32_1 = arith.constant 0 : i32
    return %c0_i32, %c0_i32_0 : i32, i32
  }
  func.func @transform_4(%arg0: i32) -> (i32, i32) {
    %c0_i32 = arith.constant 0 : i32
    %c0_i32_0 = arith.constant 0 : i32
    %c0_i32_1 = arith.constant 0 : i32
    return %c0_i32, %c0_i32_0 : i32, i32
  }
  func.func @transform_5(%arg0: i32) -> (i32, i32) {
    %c0_i32 = arith.constant 0 : i32
    %c0_i32_0 = arith.constant 0 : i32
    %c0_i32_1 = arith.constant 0 : i32
    return %c0_i32, %c0_i32_0 : i32, i32
  }
  func.func @transform_6(%arg0: i32) -> (i32, i32) {
    %c0_i32 = arith.constant 0 : i32
    %c0_i32_0 = arith.constant 0 : i32
    return %arg0, %c0_i32 : i32, i32
  }
  func.func @transform_7(%arg0: i32) -> (i32, i32) {
    %c0_i32 = arith.constant 0 : i32
    %c0_i32_0 = arith.constant 0 : i32
    return %arg0, %c0_i32 : i32, i32
  }
}

</mosaic_0001>

<bundles_post_ra>
// kernel: _lambda_.1
= control target key start
LH: loop header
LB: loop body
LE: loop exit
PB: predicated region body
PF: predicated region fallthrough
CT: control target
= control target key end

     0   :  { %vm131_vm0 = vcmask 1043456   ;;  %vm82_vm1 = vcmask 64512   ;;  %vm291_vm2 = vcmask 261120   ;;  %s2420_s1 = inlined_call_operand.vmem [shape: bf16[8,32], index: 1, kind: input, shape index: {}]   ;;  %s2421_s0 = inlined_call_operand.vmem [shape: f32[256,8], index: 0, kind: input, shape index: {}]   ;;  %s2422_s5 = inlined_call_operand.vmem [shape: f32[1,640], index: 5, kind: input, shape index: {}]   ;;  %s2423_s2 = inlined_call_operand.vmem [shape: bf16[32,128], index: 2, kind: input, shape index: {}]   ;;  %s2424_s3 = inlined_call_operand.vmem [shape: bf16[128,32], index: 3, kind: input, shape index: {}]   ;;  %s2425_s7 = inlined_call_operand.vmem [shape: bf16[256,128], index: 7, kind: output, shape index: {1}]   ;;  %s2426_s4 = inlined_call_operand.vmem [shape: bf16[32,256], index: 4, kind: input, shape index: {}]   ;;  %s2427_s6 = inlined_call_operand.vmem [shape: bf16[256,256], index: 6, kind: output, shape index: {0}]  }
   0x1   :  { %v78_v0 = vld [vmem:[%s2420_s1] sm:$0xf]  ;;  %v27_v2 = vld [vmem:[%s2421_s0 + $0x8] sm:$0xff]  ;;  %v28_v5 = vld [vmem:[%s2421_s0 + $0x10] sm:$0xff] }
   0x2   :  { %v26_v1 = vld [vmem:[%s2421_s0] sm:$0xff]  ;;  %v133_v3 = vsel %vm131_vm0, %v78_v0, 0  ;;  %v29_v6 = vld [vmem:[%s2421_s0 + $0x18] sm:$0xff]  ;;  %v36_v8 = vld [vmem:[%s2421_s0 + $0x50] sm:$0xff] }
   0x3   :  { %v58_v4 = vpack.c.bf16 %v27_v2, %v26_v1  ;;  %142 = vmatpush.bf16.msra.mxu0 %v133_v3  ;;  %1637 = vmatpush.bf16.msra.mxu1 %v133_v3  ;;  %v59_v7 = vpack.c.bf16 %v29_v6, %v28_v5  ;;  %v37_v9 = vld [vmem:[%s2421_s0 + $0x58] sm:$0xff]  ;;  %v1529_v10 = vld [vmem:[%s2423_s2 + $0x8] sm:$0xff]  ;;  %v30_v12 = vld [vmem:[%s2421_s0 + $0x20] sm:$0xff] }
   0x4   :  { %1638 = vmatpush.bf16.msra.mxu2 %v133_v3  ;;  %1639 = vmatpush.bf16.msra.mxu3 %v133_v3  ;;  %v63_v11 = vpack.c.bf16 %v37_v9, %v36_v8  ;;  %v31_v13 = vld [vmem:[%s2421_s0 + $0x28] sm:$0xff]  ;;  %v38_v15 = vld [vmem:[%s2421_s0 + $0x60] sm:$0xff]  ;;  %v32_v19 = vld [vmem:[%s2421_s0 + $0x30] sm:$0xff] }
   0x5   :  { %v60_v14 = vpack.c.bf16 %v31_v13, %v30_v12  ;;  %v39_v16 = vld [vmem:[%s2421_s0 + $0x68] sm:$0xff]  ;;  %v1528_v18 = vld [vmem:[%s2423_s2] sm:$0xff]  ;;  %v33_v20 = vld [vmem:[%s2421_s0 + $0x38] sm:$0xff] }
   0x6   :  { %1408 = vmatmul.msk.bf16.vlgmr.msra.gmra.mxu0 %vm82_vm1, %v58_v4  ;;  %1413 = vmatmul.msk.bf16.vlgmr.msra.gmra.mxu1 %vm82_vm1, %v63_v11  ;;  %v64_v17 = vpack.c.bf16 %v39_v16, %v38_v15  ;;  %v61_v21 = vpack.c.bf16 %v33_v20, %v32_v19  ;;  %v40_v22 = vld [vmem:[%s2421_s0 + $0x70] sm:$0xff]  ;;  %v41_v23 = vld [vmem:[%s2421_s0 + $0x78] sm:$0xff]  ;;  %v34_v25 = vld [vmem:[%s2421_s0 + $0x40] sm:$0xff] }
   0x7   :  { %346 = vmatpush.bf16.msrb.mxu1 %v1529_v10  ;;  %v65_v24 = vpack.c.bf16 %v41_v23, %v40_v22  ;;  %v35_v26 = vld [vmem:[%s2421_s0 + $0x48] sm:$0xff]  ;;  %v42_v28 = vld [vmem:[%s2421_s0 + $0x80] sm:$0xff]  ;;  %v44_v31 = vld [vmem:[%s2421_s0 + $0x90] sm:$0xff] }
   0x8   :  { %v62_v27 = vpack.c.bf16 %v35_v26, %v34_v25  ;;  %v43_v29 = vld [vmem:[%s2421_s0 + $0x88] sm:$0xff]  ;;  %v45_v32 = vld [vmem:[%s2421_s0 + $0x98] sm:$0xff]  ;;  %v46_v34 = vld [vmem:[%s2421_s0 + $0xa0] sm:$0xff] }
   0x9   :  { %v66_v30 = vpack.c.bf16 %v43_v29, %v42_v28  ;;  %v67_v33 = vpack.c.bf16 %v45_v32, %v44_v31  ;;  %v47_v35 = vld [vmem:[%s2421_s0 + $0xa8] sm:$0xff]  ;;  %v48_v38 = vld [vmem:[%s2421_s0 + $0xb0] sm:$0xff]  ;;  %v49_v39 = vld [vmem:[%s2421_s0 + $0xb8] sm:$0xff] }
   0xa   :  { %v68_v36 = vpack.c.bf16 %v47_v35, %v46_v34  ;;  %v1972_v40 = vld [vmem:[%s2422_s5] ss:$0 sm:$0xff]  ;;  %v69_v41 = vpack.c.bf16 %v49_v39, %v48_v38  ;;  %v51_v50 = vld [vmem:[%s2421_s0 + $0xc8] sm:$0xff]  ;;  %v52_v59 = vld [vmem:[%s2421_s0 + $0xd0] sm:$0xff] }
   0xb   :  { %347 = vmatpush.bf16.msrb.mxu1 %v1528_v18  ;;  %v50_v49 = vld [vmem:[%s2421_s0 + $0xc0] sm:$0xff]  ;;  %v53_v60 = vld [vmem:[%s2421_s0 + $0xd8] sm:$0xff]  ;;  %v55_v6 = vld [vmem:[%s2421_s0 + $0xe8] sm:$0xff] }
   0xc   :  { %1418 = vmatmul.msk.bf16.vlgmr.msra.gmra.mxu2 %vm82_vm1, %v68_v36  ;;  %v70_v51 = vpack.c.bf16 %v51_v50, %v50_v49  ;;  %v71_v61 = vpack.c.bf16 %v53_v60, %v52_v59  ;;  %v54_v5 = vld [vmem:[%s2421_s0 + $0xe0] sm:$0xff]  ;;  %v57_v18 = vld [vmem:[%s2421_s0 + $0xf8] sm:$0xff]  ;;  %v1536_v36 = vld [vmem:[%s2424_s3 + $0x30] sm:$0xff] }
   0xd   :  { %v72_v8 = vpack.c.bf16 %v55_v6, %v54_v5  ;;  %v1537_v35 = vld [vmem:[%s2424_s3 + $0x38] sm:$0xff]  ;;  %v1532_v50 = vld [vmem:[%s2424_s3 + $0x10] sm:$0xff] }
   0xe   :  { %1420 = vmatmul.msk.bf16.vlgmr.msra.gmra.mxu3 %vm82_vm1, %v70_v51  ;;  %656 = vmatpush.bf16.msrb.mxu2 %v1537_v35 }
  0x12   :  { %657 = vmatpush.bf16.msrb.mxu2 %v1536_v36 }
  0x16   :  { %1409 = vmatmul.msk.bf16.gmra.mxu0 %vm82_vm1, %v59_v7  ;;  %1414 = vmatmul.msk.bf16.gmra.mxu1 %vm82_vm1, %v64_v17  ;;  %v56_v17 = vld [vmem:[%s2421_s0 + $0xf0] sm:$0xff] }
  0x17   :  { %v73_v20 = vpack.c.bf16 %v57_v18, %v56_v17 }
  0x1c   :  { %1419 = vmatmul.msk.bf16.gmra.mxu2 %vm82_vm1, %v69_v41 }
  0x1e   :  { %1421 = vmatmul.msk.bf16.gmra.mxu3 %vm82_vm1, %v71_v61 }
  0x26   :  { %1410 = vmatmul.msk.bf16.gmra.mxu0 %vm82_vm1, %v60_v14  ;;  %1415 = vmatmul.msk.bf16.gmra.mxu1 %vm82_vm1, %v65_v24 }
  0x2e   :  { %1422 = vmatmul.msk.bf16.gmra.mxu3 %vm82_vm1, %v72_v8 }
  0x36   :  { %1411 = vmatmul.msk.bf16.gmra.mxu0 %vm82_vm1, %v61_v21  ;;  %1416 = vmatmul.msk.bf16.gmra.mxu1 %vm82_vm1, %v66_v30 }
  0x3e   :  { %1423 = vmatmul.msk.bf16.gmra.mxu3 %vm82_vm1, %v73_v20 }
  0x46   :  { %1412 = vmatmul.msk.bf16.gmra.mxu0 %vm82_vm1, %v62_v27  ;;  %1417 = vmatmul.msk.bf16.gmra.mxu1 %vm82_vm1, %v67_v33 }
  0x83   :  { %v144_v37 = vpop.f32.mrf.mxu0  ;;  %v169_v1 = vpop.f32.mrf.mxu1 }
  0x84   :  { %v145_v42 = vadd.f32 %v1972_v40, %v144_v37  ;;  %v170_v29 = vadd.f32 %v1972_v40, %v169_v1 }
  0x86   :  { %v224_v45 = vmax.f32 %v145_v42, 0.0  ;;  %v234_v31 = vmax.f32 %v170_v29, 0.0 }
  0x8b   :  { %v146_v43 = vpop.f32.mrf.mxu0  ;;  %v171_v9 = vpop.f32.mrf.mxu1 }
  0x8c   :  { %v147_v44 = vadd.f32 %v1972_v40, %v146_v43  ;;  %v172_v30 = vadd.f32 %v1972_v40, %v171_v9  ;;  %v1535_v43 = vld [vmem:[%s2424_s3 + $0x28] sm:$0xff] }
  0x8d   :  { %658 = vmatpush.bf16.msrb.mxu2 %v1535_v43 }
  0x8e   :  { %v225_v46 = vmax.f32 %v147_v44, 0.0  ;;  %v235_v32 = vmax.f32 %v172_v30, 0.0 }
  0x90   :  { %v256_v47 = vpack.c.bf16 %v225_v46, %v224_v45  ;;  %v261_v34 = vpack.c.bf16 %v235_v32, %v234_v31  ;;  %v1534_v45 = vld [vmem:[%s2424_s3 + $0x20] sm:$0xff] }
  0x91   :  { %659 = vmatpush.bf16.msrb.mxu2 %v1534_v45  ;;  %v204_v31 = vpop.f32.mrf.mxu3 }
  0x92   :  { %1432 = vmatmul.msk.bf16.vlgmr.msrb.gmra.mxu1 %vm291_vm2, %v256_v47  ;;  %v1533_v47 = vld [vmem:[%s2424_s3 + $0x18] sm:$0xff] }
  0x93   :  { %v149_v48 = vpop.f32.mrf.mxu0  ;;  %v174_v16 = vpop.f32.mrf.mxu1 }
  0x94   :  { %v150_v52 = vadd.f32 %v1972_v40, %v149_v48  ;;  %v175_v37 = vadd.f32 %v1972_v40, %v174_v16 }
  0x95   :  { %660 = vmatpush.bf16.msrb.mxu2 %v1533_v47 }
  0x96   :  { %v226_v55 = vmax.f32 %v150_v52, 0.0  ;;  %v236_v41 = vmax.f32 %v175_v37, 0.0 }
  0x99   :  { %661 = vmatpush.bf16.msrb.mxu2 %v1532_v50 }
  0x9b   :  { %v151_v53 = vpop.f32.mrf.mxu0  ;;  %v176_v23 = vpop.f32.mrf.mxu1 }
  0x9c   :  { %v152_v54 = vadd.f32 %v1972_v40, %v151_v53  ;;  %v177_v38 = vadd.f32 %v1972_v40, %v176_v23 }
  0x9e   :  { %v227_v56 = vmax.f32 %v152_v54, 0.0  ;;  %v237_v42 = vmax.f32 %v177_v38, 0.0  ;;  %v1531_v54 = vld [vmem:[%s2424_s3 + $0x8] sm:$0xff] }
  0x9f   :  { %662 = vmatpush.bf16.msrb.mxu2 %v1531_v54 }
  0xa0   :  { %v257_v57 = vpack.c.bf16 %v227_v56, %v226_v55  ;;  %v262_v44 = vpack.c.bf16 %v237_v42, %v236_v41  ;;  %v1530_v56 = vld [vmem:[%s2424_s3] sm:$0xff] }
  0xa2   :  { %1433 = vmatmul.msk.bf16.gmra.mxu1 %vm291_vm2, %v257_v57 }
  0xa3   :  { %v154_v58 = vpop.f32.mrf.mxu0  ;;  %v179_v28 = vpop.f32.mrf.mxu1  ;;  %663 = vmatpush.bf16.msrb.mxu2 %v1530_v56 }
  0xa4   :  { %v155_v62 = vadd.f32 %v1972_v40, %v154_v58  ;;  %v180_v48 = vadd.f32 %v1972_v40, %v179_v28 }
  0xa6   :  { %v228_v2 = vmax.f32 %v155_v62, 0.0  ;;  %v238_v51 = vmax.f32 %v180_v48, 0.0  ;;  %v2056_v62 = vld [vmem:[%s2422_s5 + $0x1] ss:$0 sm:$0xff] }
  0xab   :  { %v156_v63 = vpop.f32.mrf.mxu0  ;;  %v181_v33 = vpop.f32.mrf.mxu1 }
  0xac   :  { %v157_v0 = vadd.f32 %v1972_v40, %v156_v63  ;;  %v182_v49 = vadd.f32 %v1972_v40, %v181_v33 }
  0xae   :  { %v229_v3 = vmax.f32 %v157_v0, 0.0  ;;  %v239_v52 = vmax.f32 %v182_v49, 0.0 }
  0xb0   :  { %v258_v4 = vpack.c.bf16 %v229_v3, %v228_v2  ;;  %v263_v55 = vpack.c.bf16 %v239_v52, %v238_v51  ;;  %v194_v3 = vpop.f32.mrf.mxu2 }
  0xb2   :  { %1434 = vmatmul.msk.bf16.gmra.mxu1 %vm291_vm2, %v258_v4 }
  0xb3   :  { %v159_v7 = vpop.f32.mrf.mxu0  ;;  %v184_v39 = vpop.f32.mrf.mxu1 }
  0xb4   :  { %v160_v10 = vadd.f32 %v1972_v40, %v159_v7  ;;  %v185_v58 = vadd.f32 %v1972_v40, %v184_v39 }
  0xb6   :  { %v230_v13 = vmax.f32 %v160_v10, 0.0  ;;  %v240_v60 = vmax.f32 %v185_v58, 0.0 }
  0xbb   :  { %v161_v11 = vpop.f32.mrf.mxu0  ;;  %v186_v46 = vpop.f32.mrf.mxu1 }
  0xbc   :  { %v162_v12 = vadd.f32 %v1972_v40, %v161_v11  ;;  %v187_v59 = vadd.f32 %v1972_v40, %v186_v46  ;;  %v206_v46 = vpop.f32.mrf.mxu3 }
  0xbe   :  { %v231_v14 = vmax.f32 %v162_v12, 0.0  ;;  %v241_v61 = vmax.f32 %v187_v59, 0.0 }
  0xc0   :  { %v259_v15 = vpack.c.bf16 %v231_v14, %v230_v13  ;;  %v264_v0 = vpack.c.bf16 %v241_v61, %v240_v60 }
  0xc2   :  { %1435 = vmatmul.msk.bf16.gmra.mxu1 %vm291_vm2, %v259_v15  ;;  %v196_v15 = vpop.f32.mrf.mxu2 }
  0xc3   :  { %v164_v19 = vpop.f32.mrf.mxu0  ;;  %v189_v53 = vpop.f32.mrf.mxu1  ;;  %v197_v23 = vadd.f32 %v1972_v40, %v196_v15 }
  0xc4   :  { %v165_v21 = vadd.f32 %v1972_v40, %v164_v19  ;;  %v190_v4 = vadd.f32 %v1972_v40, %v189_v53  ;;  %v209_v59 = vpop.f32.mrf.mxu3 }
  0xc5   :  { %v245_v28 = vmax.f32 %v197_v23, 0.0 }
  0xc6   :  { %v232_v25 = vmax.f32 %v165_v21, 0.0  ;;  %v242_v8 = vmax.f32 %v190_v4, 0.0 }
  0xcb   :  { %v166_v22 = vpop.f32.mrf.mxu0  ;;  %v191_v57 = vpop.f32.mrf.mxu1 }
  0xcc   :  { %v167_v24 = vadd.f32 %v1972_v40, %v166_v22  ;;  %v192_v5 = vadd.f32 %v1972_v40, %v191_v57  ;;  %v195_v22 = vadd.f32 %v1972_v40, %v194_v3 }
  0xce   :  { %v233_v26 = vmax.f32 %v167_v24, 0.0  ;;  %v243_v9 = vmax.f32 %v192_v5, 0.0  ;;  %v211_v5 = vpop.f32.mrf.mxu3 }
  0xd0   :  { %v260_v27 = vpack.c.bf16 %v233_v26, %v232_v25  ;;  %v265_v13 = vpack.c.bf16 %v243_v9, %v242_v8  ;;  %v199_v25 = vpop.f32.mrf.mxu2 }
  0xd1   :  { %v200_v43 = vadd.f32 %v1972_v40, %v199_v25 }
  0xd2   :  { %1436 = vmatmul.msk.bf16.gmra.mxu1 %vm291_vm2, %v260_v27  ;;  %v244_v27 = vmax.f32 %v195_v22, 0.0 }
  0xd3   :  { %v246_v48 = vmax.f32 %v200_v43, 0.0 }
  0xd4   :  { %v266_v33 = vpack.c.bf16 %v245_v28, %v244_v27 }
  0xd8   :  { %v201_v39 = vpop.f32.mrf.mxu2 }
  0xe2   :  { %1437 = vmatmul.msk.bf16.gmra.mxu1 %vm291_vm2, %v261_v34 }
  0xf2   :  { %1438 = vmatmul.msk.bf16.gmra.mxu1 %vm291_vm2, %v262_v44  ;;  %v202_v44 = vadd.f32 %v1972_v40, %v201_v39 }
  0xf4   :  { %v247_v49 = vmax.f32 %v202_v44, 0.0 }
  0xf6   :  { %v267_v53 = vpack.c.bf16 %v247_v49, %v246_v48 }
 0x102   :  { %1439 = vmatmul.msk.bf16.gmra.mxu1 %vm291_vm2, %v263_v55 }
 0x10f   :  { %v349_v63 = vpop.f32.mrf.mxu1 }
 0x110   :  { %v350_v1 = vadd.f32 %v2056_v62, %v349_v63  ;;  %v205_v63 = vadd.f32 %v1972_v40, %v204_v31 }
 0x112   :  { %1440 = vmatmul.msk.bf16.gmra.mxu1 %vm291_vm2, %v264_v0  ;;  %1645 = vtanh.f32 %v350_v1  ;;  %v207_v0 = vadd.f32 %v1972_v40, %v206_v46  ;;  %v248_v3 = vmax.f32 %v205_v63, 0.0 }
 0x114   :  { %v249_v4 = vmax.f32 %v207_v0, 0.0 }
 0x116   :  { %v268_v9 = vpack.c.bf16 %v249_v4, %v248_v3 }
 0x117   :  { %v351_v2 = vpop.f32.mrf.mxu1 }
 0x118   :  { %v352_v6 = vadd.f32 %v2056_v62, %v351_v2  ;;  %v1646_v7 = vpop.eup %1645 }
 0x119   :  { %v461_v11 = vpack.c.bf16 %v1646_v7, %v1646_v7 }
 0x11a   :  { %1647 = vtanh.f32 %v352_v6 }
 0x11b   :  { %v544_v18 = vunpack.c.l.b16 %v461_v11 }
 0x11f   :  { %v354_v10 = vpop.f32.mrf.mxu1 }
 0x120   :  { %v1648_v12 = vpop.eup %1647  ;;  %v355_v17 = vadd.f32 %v2056_v62, %v354_v10 }
 0x121   :  { %v1545_v14 = vpack.c.bf16 %v1648_v12, %v1646_v7  ;;  %v462_v16 = vpack.c.bf16 %v1648_v12, %v1648_v12 }
 0x122   :  { %1441 = vmatmul.msk.bf16.gmra.mxu1 %vm291_vm2, %v265_v13  ;;  %1649 = vtanh.f32 %v355_v17  ;;  %v214_v17 = vpop.f32.mrf.mxu3 }
 0x123   :  { %1546 = vst [vmem:[%s2425_s7] sm:$0xff] %v1545_v14   ;;  %v545_v19 = vunpack.c.l.b16 %v462_v16  ;;  %v215_v43 = vadd.f32 %v1972_v40, %v214_v17 }
 0x125   :  { %v576_v20 = vpack.c.b16 %v545_v19, %v544_v18  ;;  %v210_v18 = vadd.f32 %v1972_v40, %v209_v59  ;;  %v212_v19 = vadd.f32 %v1972_v40, %v211_v5  ;;  %v252_v48 = vmax.f32 %v215_v43, 0.0 }
 0x127   :  { %v356_v21 = vpop.f32.mrf.mxu1  ;;  %664 = vmatmul.bf16.vlgmr.msrb.gmra.mxu2 %v576_v20  ;;  %v250_v22 = vmax.f32 %v210_v18, 0.0  ;;  %v251_v23 = vmax.f32 %v212_v19, 0.0 }
 0x128   :  { %v357_v24 = vadd.f32 %v2056_v62, %v356_v21  ;;  %v1650_v26 = vpop.eup %1649 }
 0x129   :  { %v463_v30 = vpack.c.bf16 %v1650_v26, %v1650_v26  ;;  %v269_v27 = vpack.c.bf16 %v251_v23, %v250_v22 }
 0x12a   :  { %1651 = vtanh.f32 %v357_v24 }
 0x12b   :  { %v546_v37 = vunpack.c.l.b16 %v463_v30 }
 0x12f   :  { %v359_v29 = vpop.f32.mrf.mxu1 }
 0x130   :  { %v1652_v32 = vpop.eup %1651  ;;  %v360_v36 = vadd.f32 %v2056_v62, %v359_v29  ;;  %v216_v29 = vpop.f32.mrf.mxu3 }
 0x131   :  { %v1550_v34 = vpack.c.bf16 %v1652_v32, %v1650_v26  ;;  %v464_v35 = vpack.c.bf16 %v1652_v32, %v1652_v32  ;;  %v217_v44 = vadd.f32 %v1972_v40, %v216_v29  ;;  %v1484_v29 = vld [vmem:[%s2426_s4 + $0x8] sm:$0xf0] }
 0x132   :  { %1442 = vmatmul.msk.bf16.gmra.mxu1 %vm291_vm2, %v266_v33  ;;  %1653 = vtanh.f32 %v360_v36 }
 0x133   :  { %1622 = vst [vmem:[%s2425_s7 + $0x8] sm:$0xff] %v1550_v34   ;;  %v547_v38 = vunpack.c.l.b16 %v464_v35  ;;  %v1490_v34 = vld [vmem:[%s2426_s4 + $0x10] sm:$0xf]  ;;  %v1541_v35 = vld [vmem:[%s2426_s4 + $0x14] sm:$0xf0]  ;;  %v253_v49 = vmax.f32 %v217_v44, 0.0 }
 0x134   :  { %v1491_v36 = vor.u32 %v1541_v35, %v1490_v34 }
 0x135   :  { %v577_v41 = vpack.c.b16 %v547_v38, %v546_v37  ;;  %v1540_v37 = vld [vmem:[%s2426_s4 + $0x14] sm:$0xf]  ;;  %v1492_v38 = vld [vmem:[%s2426_s4 + $0x18] sm:$0xf0] }
 0x136   :  { %876 = vmatpush.bf16.msrb.mxu3 %v1491_v36 }
 0x137   :  { %v361_v42 = vpop.f32.mrf.mxu1  ;;  %669 = vmatmul.bf16.gmra.mxu2 %v577_v41  ;;  %v1495_v41 = vor.u32 %v1540_v37, %v1492_v38 }
 0x138   :  { %v362_v45 = vadd.f32 %v2056_v62, %v361_v42  ;;  %v1654_v47 = vpop.eup %1653  ;;  %v219_v46 = vpop.f32.mrf.mxu3 }
 0x139   :  { %v465_v51 = vpack.c.bf16 %v1654_v47, %v1654_v47  ;;  %965 = vmatpush.bf16.msrb.mxu0 %v1495_v41  ;;  %1640 = vmatpush.bf16.msra.mxu2 %v1495_v41  ;;  %v220_v63 = vadd.f32 %v1972_v40, %v219_v46 }
 0x13a   :  { %1655 = vtanh.f32 %v362_v45 }
 0x13b   :  { %v548_v57 = vunpack.c.l.b16 %v465_v51  ;;  %v254_v3 = vmax.f32 %v220_v63, 0.0 }
 0x13f   :  { %v364_v50 = vpop.f32.mrf.mxu1 }
 0x140   :  { %v1656_v52 = vpop.eup %1655  ;;  %v365_v56 = vadd.f32 %v2056_v62, %v364_v50  ;;  %v221_v59 = vpop.f32.mrf.mxu3 }
 0x141   :  { %v1555_v54 = vpack.c.bf16 %v1656_v52, %v1654_v47  ;;  %v466_v55 = vpack.c.bf16 %v1656_v52, %v1656_v52  ;;  %v222_v0 = vadd.f32 %v1972_v40, %v221_v59 }
 0x142   :  { %1443 = vmatmul.msk.bf16.gmra.mxu1 %vm291_vm2, %v267_v53  ;;  %1657 = vtanh.f32 %v365_v56  ;;  %v270_v53 = vpack.c.bf16 %v253_v49, %v252_v48  ;;  %v2154_v49 = vld [vmem:[%s2422_s5 + $0x2] ss:$0 sm:$0xff] }
 0x143   :  { %1623 = vst [vmem:[%s2425_s7 + $0x10] sm:$0xff] %v1555_v54   ;;  %v549_v58 = vunpack.c.l.b16 %v466_v55  ;;  %v255_v4 = vmax.f32 %v222_v0, 0.0 }
 0x145   :  { %v578_v60 = vpack.c.b16 %v549_v58, %v548_v57 }
 0x147   :  { %v366_v61 = vpop.f32.mrf.mxu1  ;;  %674 = vmatmul.bf16.gmra.mxu2 %v578_v60 }
 0x148   :  { %v367_v1 = vadd.f32 %v2056_v62, %v366_v61  ;;  %v1658_v2 = vpop.eup %1657 }
 0x149   :  { %v467_v7 = vpack.c.bf16 %v1658_v2, %v1658_v2 }
 0x14a   :  { %1659 = vtanh.f32 %v367_v1 }
 0x14b   :  { %v550_v13 = vunpack.c.l.b16 %v467_v7 }
 0x14f   :  { %v369_v6 = vpop.f32.mrf.mxu1 }
 0x150   :  { %v1660_v8 = vpop.eup %1659  ;;  %v370_v12 = vadd.f32 %v2056_v62, %v369_v6 }
 0x151   :  { %v1560_v10 = vpack.c.bf16 %v1660_v8, %v1658_v2  ;;  %v468_v11 = vpack.c.bf16 %v1660_v8, %v1660_v8  ;;  %v271_v8 = vpack.c.bf16 %v255_v4, %v254_v3 }
 0x152   :  { %1444 = vmatmul.msk.bf16.gmra.mxu1 %vm291_vm2, %v268_v9  ;;  %1661 = vtanh.f32 %v370_v12 }
 0x153   :  { %1624 = vst [vmem:[%s2425_s7 + $0x18] sm:$0xff] %v1560_v10   ;;  %v551_v14 = vunpack.c.l.b16 %v468_v11 }
 0x155   :  { %v579_v15 = vpack.c.b16 %v551_v14, %v550_v13  ;;  %v1482_v13 = vld [vmem:[%s2426_s4] sm:$0xf]  ;;  %v1539_v14 = vld [vmem:[%s2426_s4 + $0x4] sm:$0xf0] }
 0x157   :  { %v371_v16 = vpop.f32.mrf.mxu1  ;;  %679 = vmatmul.bf16.gmra.mxu2 %v579_v15  ;;  %v1483_v15 = vor.u32 %v1539_v14, %v1482_v13 }
 0x158   :  { %v372_v20 = vadd.f32 %v2056_v62, %v371_v16  ;;  %v1662_v21 = vpop.eup %1661 }
 0x159   :  { %v469_v25 = vpack.c.bf16 %v1662_v21, %v1662_v21  ;;  %877 = vmatpush.bf16.msrb.mxu3 %v1483_v15 }
 0x15a   :  { %1663 = vtanh.f32 %v372_v20 }
 0x15b   :  { %v552_v32 = vunpack.c.l.b16 %v469_v25 }
 0x15f   :  { %v374_v24 = vpop.f32.mrf.mxu1 }
 0x160   :  { %v1664_v26 = vpop.eup %1663  ;;  %v375_v31 = vadd.f32 %v2056_v62, %v374_v24 }
 0x161   :  { %v1565_v28 = vpack.c.bf16 %v1664_v26, %v1662_v21  ;;  %v470_v30 = vpack.c.bf16 %v1664_v26, %v1664_v26 }
 0x162   :  { %1445 = vmatmul.msk.bf16.gmra.mxu1 %vm291_vm2, %v269_v27  ;;  %1665 = vtanh.f32 %v375_v31 }
 0x163   :  { %1625 = vst [vmem:[%s2425_s7 + $0x20] sm:$0xff] %v1565_v28   ;;  %v553_v33 = vunpack.c.l.b16 %v470_v30  ;;  %v1538_v28 = vld [vmem:[%s2426_s4 + $0x4] sm:$0xf] }
 0x164   :  { %v1487_v30 = vor.u32 %v1538_v28, %v1484_v29 }
 0x165   :  { %v580_v39 = vpack.c.b16 %v553_v33, %v552_v32 }
 0x166   :  { %966 = vmatpush.bf16.msrb.mxu0 %v1487_v30  ;;  %1641 = vmatpush.bf16.msra.mxu2 %v1487_v30 }
 0x167   :  { %v376_v42 = vpop.f32.mrf.mxu1  ;;  %684 = vmatmul.bf16.gmra.mxu2 %v580_v39 }
 0x168   :  { %v377_v45 = vadd.f32 %v2056_v62, %v376_v42  ;;  %v1666_v47 = vpop.eup %1665 }
 0x169   :  { %v471_v51 = vpack.c.bf16 %v1666_v47, %v1666_v47 }
 0x16a   :  { %1667 = vtanh.f32 %v377_v45 }
 0x16b   :  { %v554_v57 = vunpack.c.l.b16 %v471_v51 }
 0x16f   :  { %v379_v50 = vpop.f32.mrf.mxu1 }
 0x170   :  { %v1668_v52 = vpop.eup %1667  ;;  %v380_v56 = vadd.f32 %v2056_v62, %v379_v50 }
 0x171   :  { %v1570_v54 = vpack.c.bf16 %v1668_v52, %v1666_v47  ;;  %v472_v55 = vpack.c.bf16 %v1668_v52, %v1668_v52 }
 0x172   :  { %1446 = vmatmul.msk.bf16.gmra.mxu1 %vm291_vm2, %v270_v53  ;;  %1669 = vtanh.f32 %v380_v56 }
 0x173   :  { %1626 = vst [vmem:[%s2425_s7 + $0x28] sm:$0xff] %v1570_v54   ;;  %v555_v58 = vunpack.c.l.b16 %v472_v55 }
 0x175   :  { %v581_v60 = vpack.c.b16 %v555_v58, %v554_v57 }
 0x177   :  { %v381_v61 = vpop.f32.mrf.mxu1  ;;  %689 = vmatmul.bf16.gmra.mxu2 %v581_v60 }
 0x178   :  { %v382_v1 = vadd.f32 %v2056_v62, %v381_v61  ;;  %v1670_v2 = vpop.eup %1669 }
 0x179   :  { %v473_v6 = vpack.c.bf16 %v1670_v2, %v1670_v2 }
 0x17a   :  { %1671 = vtanh.f32 %v382_v1 }
 0x17b   :  { %v556_v40 = vunpack.c.l.b16 %v473_v6 }
 0x17f   :  { %v384_v5 = vpop.f32.mrf.mxu1 }
 0x180   :  { %v1672_v7 = vpop.eup %1671  ;;  %v385_v11 = vadd.f32 %v2056_v62, %v384_v5 }
 0x181   :  { %v1575_v9 = vpack.c.bf16 %v1672_v7, %v1670_v2  ;;  %v474_v10 = vpack.c.bf16 %v1672_v7, %v1672_v7 }
 0x182   :  { %1447 = vmatmul.msk.bf16.gmra.mxu1 %vm291_vm2, %v271_v8  ;;  %1673 = vtanh.f32 %v385_v11 }
 0x183   :  { %1627 = vst [vmem:[%s2425_s7 + $0x30] sm:$0xff] %v1575_v9   ;;  %v557_v12 = vunpack.c.l.b16 %v474_v10 }
 0x185   :  { %v582_v16 = vpack.c.b16 %v557_v12, %v556_v40 }
 0x187   :  { %v386_v17 = vpop.f32.mrf.mxu1  ;;  %694 = vmatmul.bf16.gmra.mxu2 %v582_v16 }
 0x188   :  { %v387_v18 = vadd.f32 %v2056_v62, %v386_v17  ;;  %v1674_v19 = vpop.eup %1673 }
 0x189   :  { %v475_v21 = vpack.c.bf16 %v1674_v19, %v1674_v19 }
 0x18a   :  { %1675 = vtanh.f32 %v387_v18 }
 0x18b   :  { %v558_v26 = vunpack.c.l.b16 %v475_v21 }
 0x18f   :  { %v389_v20 = vpop.f32.mrf.mxu1 }
 0x190   :  { %v1676_v22 = vpop.eup %1675  ;;  %v390_v25 = vadd.f32 %v2056_v62, %v389_v20 }
 0x191   :  { %v1580_v23 = vpack.c.bf16 %v1676_v22, %v1674_v19  ;;  %v476_v24 = vpack.c.bf16 %v1676_v22, %v1676_v22 }
 0x192   :  { %1677 = vtanh.f32 %v390_v25 }
 0x193   :  { %1628 = vst [vmem:[%s2425_s7 + $0x38] sm:$0xff] %v1580_v23   ;;  %v559_v27 = vunpack.c.l.b16 %v476_v24 }
 0x195   :  { %v583_v31 = vpack.c.b16 %v559_v27, %v558_v26 }
 0x197   :  { %v391_v32 = vpop.f32.mrf.mxu1  ;;  %699 = vmatmul.bf16.gmra.mxu2 %v583_v31 }
 0x198   :  { %v392_v33 = vadd.f32 %v2056_v62, %v391_v32  ;;  %v1678_v34 = vpop.eup %1677 }
 0x199   :  { %v477_v36 = vpack.c.bf16 %v1678_v34, %v1678_v34 }
 0x19a   :  { %1679 = vtanh.f32 %v392_v33 }
 0x19b   :  { %v560_v42 = vunpack.c.l.b16 %v477_v36 }
 0x19f   :  { %v394_v35 = vpop.f32.mrf.mxu1 }
 0x1a0   :  { %v1680_v37 = vpop.eup %1679  ;;  %v395_v41 = vadd.f32 %v2056_v62, %v394_v35 }
 0x1a1   :  { %v1585_v38 = vpack.c.bf16 %v1680_v37, %v1678_v34  ;;  %v478_v39 = vpack.c.bf16 %v1680_v37, %v1680_v37 }
 0x1a2   :  { %1681 = vtanh.f32 %v395_v41 }
 0x1a3   :  { %1629 = vst [vmem:[%s2425_s7 + $0x40] sm:$0xff] %v1585_v38   ;;  %v561_v43 = vunpack.c.l.b16 %v478_v39 }
 0x1a5   :  { %v584_v44 = vpack.c.b16 %v561_v43, %v560_v42 }
 0x1a7   :  { %v396_v45 = vpop.f32.mrf.mxu1  ;;  %704 = vmatmul.bf16.gmra.mxu2 %v584_v44 }
 0x1a8   :  { %v397_v46 = vadd.f32 %v2056_v62, %v396_v45  ;;  %v1682_v48 = vpop.eup %1681 }
 0x1a9   :  { %v479_v51 = vpack.c.bf16 %v1682_v48, %v1682_v48 }
 0x1aa   :  { %1683 = vtanh.f32 %v397_v46  ;;  %v665_v47 = vpop.f32.mrf.mxu2 }
 0x1ab   :  { %v666_v54 = vadd.f32 %v2154_v49, %v665_v47  ;;  %v562_v59 = vunpack.c.l.b16 %v479_v51 }
 0x1ad   :  { %v745_v61 = vmax.f32 %v666_v54, 0.0 }
 0x1af   :  { %v399_v50 = vpop.f32.mrf.mxu1 }
 0x1b0   :  { %v1684_v52 = vpop.eup %1683  ;;  %v400_v56 = vadd.f32 %v2056_v62, %v399_v50 }
 0x1b1   :  { %v1590_v53 = vpack.c.bf16 %v1684_v52, %v1682_v48  ;;  %v480_v55 = vpack.c.bf16 %v1684_v52, %v1684_v52 }
 0x1b2   :  { %v667_v57 = vpop.f32.mrf.mxu2  ;;  %1685 = vtanh.f32 %v400_v56 }
 0x1b3   :  { %1630 = vst [vmem:[%s2425_s7 + $0x48] sm:$0xff] %v1590_v53   ;;  %v668_v58 = vadd.f32 %v2154_v49, %v667_v57  ;;  %v563_v60 = vunpack.c.l.b16 %v480_v55 }
 0x1b5   :  { %v746_v63 = vmax.f32 %v668_v58, 0.0  ;;  %v585_v0 = vpack.c.b16 %v563_v60, %v562_v59 }
 0x1b7   :  { %v777_v1 = vpack.c.bf16 %v746_v63, %v745_v61  ;;  %v401_v2 = vpop.f32.mrf.mxu1  ;;  %709 = vmatmul.bf16.gmra.mxu2 %v585_v0 }
 0x1b8   :  { %v402_v3 = vadd.f32 %v2056_v62, %v401_v2  ;;  %v1686_v5 = vpop.eup %1685 }
 0x1b9   :  { %1496 = vmatmul.msk.bf16.vlgmr.msrb.gmra.mxu3 %vm291_vm2, %v777_v1  ;;  %1512 = vmatmul.msk.bf16.vlgmr.msrb.gmra.mxu0 %vm291_vm2, %v777_v1  ;;  %v481_v7 = vpack.c.bf16 %v1686_v5, %v1686_v5 }
 0x1ba   :  { %1687 = vtanh.f32 %v402_v3  ;;  %v670_v4 = vpop.f32.mrf.mxu2 }
 0x1bb   :  { %v671_v10 = vadd.f32 %v2154_v49, %v670_v4  ;;  %v564_v14 = vunpack.c.l.b16 %v481_v7 }
 0x1bd   :  { %v747_v16 = vmax.f32 %v671_v10, 0.0 }
 0x1bf   :  { %v404_v6 = vpop.f32.mrf.mxu1 }
 0x1c0   :  { %v1688_v8 = vpop.eup %1687  ;;  %v405_v40 = vadd.f32 %v2056_v62, %v404_v6 }
 0x1c1   :  { %v1595_v9 = vpack.c.bf16 %v1688_v8, %v1686_v5  ;;  %v482_v11 = vpack.c.bf16 %v1688_v8, %v1688_v8 }
 0x1c2   :  { %v672_v12 = vpop.f32.mrf.mxu2  ;;  %1689 = vtanh.f32 %v405_v40 }
 0x1c3   :  { %1631 = vst [vmem:[%s2425_s7 + $0x50] sm:$0xff] %v1595_v9   ;;  %v673_v13 = vadd.f32 %v2154_v49, %v672_v12  ;;  %v565_v15 = vunpack.c.l.b16 %v482_v11 }
 0x1c5   :  { %v748_v17 = vmax.f32 %v673_v13, 0.0  ;;  %v586_v18 = vpack.c.b16 %v565_v15, %v564_v14 }
 0x1c7   :  { %v406_v19 = vpop.f32.mrf.mxu1  ;;  %714 = vmatmul.bf16.gmra.mxu2 %v586_v18  ;;  %v778_v20 = vpack.c.bf16 %v748_v17, %v747_v16 }
 0x1c8   :  { %v407_v21 = vadd.f32 %v2056_v62, %v406_v19  ;;  %v1690_v23 = vpop.eup %1689 }
 0x1c9   :  { %1497 = vmatmul.msk.bf16.gmra.mxu3 %vm291_vm2, %v778_v20  ;;  %1513 = vmatmul.msk.bf16.gmra.mxu0 %vm291_vm2, %v778_v20  ;;  %v483_v25 = vpack.c.bf16 %v1690_v23, %v1690_v23 }
 0x1ca   :  { %1691 = vtanh.f32 %v407_v21  ;;  %v675_v22 = vpop.f32.mrf.mxu2 }
 0x1cb   :  { %v676_v28 = vadd.f32 %v2154_v49, %v675_v22  ;;  %v566_v33 = vunpack.c.l.b16 %v483_v25 }
 0x1cd   :  { %v749_v35 = vmax.f32 %v676_v28, 0.0 }
 0x1cf   :  { %v409_v24 = vpop.f32.mrf.mxu1 }
 0x1d0   :  { %v1692_v26 = vpop.eup %1691  ;;  %v410_v30 = vadd.f32 %v2056_v62, %v409_v24 }
 0x1d1   :  { %v1600_v27 = vpack.c.bf16 %v1692_v26, %v1690_v23  ;;  %v484_v29 = vpack.c.bf16 %v1692_v26, %v1692_v26 }
 0x1d2   :  { %v677_v31 = vpop.f32.mrf.mxu2  ;;  %1693 = vtanh.f32 %v410_v30 }
 0x1d3   :  { %1632 = vst [vmem:[%s2425_s7 + $0x58] sm:$0xff] %v1600_v27   ;;  %v678_v32 = vadd.f32 %v2154_v49, %v677_v31  ;;  %v567_v34 = vunpack.c.l.b16 %v484_v29 }
 0x1d5   :  { %v750_v36 = vmax.f32 %v678_v32, 0.0  ;;  %v587_v37 = vpack.c.b16 %v567_v34, %v566_v33 }
 0x1d7   :  { %v411_v38 = vpop.f32.mrf.mxu1  ;;  %719 = vmatmul.bf16.gmra.mxu2 %v587_v37  ;;  %v779_v39 = vpack.c.bf16 %v750_v36, %v749_v35 }
 0x1d8   :  { %v412_v41 = vadd.f32 %v2056_v62, %v411_v38  ;;  %v1694_v43 = vpop.eup %1693 }
 0x1d9   :  { %1498 = vmatmul.msk.bf16.gmra.mxu3 %vm291_vm2, %v779_v39  ;;  %1514 = vmatmul.msk.bf16.gmra.mxu0 %vm291_vm2, %v779_v39  ;;  %v485_v45 = vpack.c.bf16 %v1694_v43, %v1694_v43 }
 0x1da   :  { %1695 = vtanh.f32 %v412_v41  ;;  %v680_v42 = vpop.f32.mrf.mxu2 }
 0x1db   :  { %v681_v48 = vadd.f32 %v2154_v49, %v680_v42  ;;  %v568_v54 = vunpack.c.l.b16 %v485_v45 }
 0x1dd   :  { %v751_v56 = vmax.f32 %v681_v48, 0.0 }
 0x1df   :  { %v414_v44 = vpop.f32.mrf.mxu1 }
 0x1e0   :  { %v1696_v46 = vpop.eup %1695  ;;  %v415_v51 = vadd.f32 %v2056_v62, %v414_v44 }
 0x1e1   :  { %v1605_v47 = vpack.c.bf16 %v1696_v46, %v1694_v43  ;;  %v486_v50 = vpack.c.bf16 %v1696_v46, %v1696_v46 }
 0x1e2   :  { %v682_v52 = vpop.f32.mrf.mxu2  ;;  %1697 = vtanh.f32 %v415_v51 }
 0x1e3   :  { %1633 = vst [vmem:[%s2425_s7 + $0x60] sm:$0xff] %v1605_v47   ;;  %v683_v53 = vadd.f32 %v2154_v49, %v682_v52  ;;  %v569_v55 = vunpack.c.l.b16 %v486_v50 }
 0x1e5   :  { %v752_v57 = vmax.f32 %v683_v53, 0.0  ;;  %v588_v58 = vpack.c.b16 %v569_v55, %v568_v54 }
 0x1e7   :  { %v416_v59 = vpop.f32.mrf.mxu1  ;;  %724 = vmatmul.bf16.gmra.mxu2 %v588_v58  ;;  %v780_v60 = vpack.c.bf16 %v752_v57, %v751_v56 }
 0x1e8   :  { %v417_v61 = vadd.f32 %v2056_v62, %v416_v59  ;;  %v1698_v0 = vpop.eup %1697 }
 0x1e9   :  { %1499 = vmatmul.msk.bf16.gmra.mxu3 %vm291_vm2, %v780_v60  ;;  %1515 = vmatmul.msk.bf16.gmra.mxu0 %vm291_vm2, %v780_v60  ;;  %v487_v2 = vpack.c.bf16 %v1698_v0, %v1698_v0  ;;  %v77_v60 = vld [vmem:[%s2422_s5 + $0x3] sm:$0x3] }
 0x1ea   :  { %1699 = vtanh.f32 %v417_v61  ;;  %v685_v63 = vpop.f32.mrf.mxu2 }
 0x1eb   :  { %v686_v5 = vadd.f32 %v2154_v49, %v685_v63  ;;  %v570_v10 = vunpack.c.l.b16 %v487_v2 }
 0x1ed   :  { %v753_v40 = vmax.f32 %v686_v5, 0.0 }
 0x1ef   :  { %v419_v1 = vpop.f32.mrf.mxu1 }
 0x1f0   :  { %v1700_v3 = vpop.eup %1699  ;;  %v420_v7 = vadd.f32 %v2056_v62, %v419_v1  ;;  %v2226_v1 = vperm.slane %v77_v60, 1 }
 0x1f1   :  { %v1610_v4 = vpack.c.bf16 %v1700_v3, %v1698_v0  ;;  %v488_v6 = vpack.c.bf16 %v1700_v3, %v1700_v3 }
 0x1f2   :  { %v687_v8 = vpop.f32.mrf.mxu2  ;;  %1701 = vtanh.f32 %v420_v7 }
 0x1f3   :  { %1634 = vst [vmem:[%s2425_s7 + $0x68] sm:$0xff] %v1610_v4   ;;  %v688_v9 = vadd.f32 %v2154_v49, %v687_v8  ;;  %v571_v11 = vunpack.c.l.b16 %v488_v6  ;;  %v2231_v8 = vperm.slane %v77_v60, 0 }
 0x1f5   :  { %v754_v12 = vmax.f32 %v688_v9, 0.0  ;;  %v589_v13 = vpack.c.b16 %v571_v11, %v570_v10 }
 0x1f7   :  { %v421_v14 = vpop.f32.mrf.mxu1  ;;  %729 = vmatmul.bf16.gmra.mxu2 %v589_v13  ;;  %v781_v15 = vpack.c.bf16 %v754_v12, %v753_v40 }
 0x1f8   :  { %v422_v16 = vadd.f32 %v2056_v62, %v421_v14  ;;  %v1702_v18 = vpop.eup %1701 }
 0x1f9   :  { %1500 = vmatmul.msk.bf16.gmra.mxu3 %vm291_vm2, %v781_v15  ;;  %1516 = vmatmul.msk.bf16.gmra.mxu0 %vm291_vm2, %v781_v15  ;;  %v489_v20 = vpack.c.bf16 %v1702_v18, %v1702_v18 }
 0x1fa   :  { %1703 = vtanh.f32 %v422_v16  ;;  %v690_v17 = vpop.f32.mrf.mxu2 }
 0x1fb   :  { %v691_v23 = vadd.f32 %v2154_v49, %v690_v17  ;;  %v572_v28 = vunpack.c.l.b16 %v489_v20 }
 0x1fd   :  { %v755_v30 = vmax.f32 %v691_v23, 0.0 }
 0x1ff   :  { %v424_v19 = vpop.f32.mrf.mxu1 }
 0x200   :  { %v1704_v21 = vpop.eup %1703  ;;  %v425_v25 = vadd.f32 %v2056_v62, %v424_v19 }
 0x201   :  { %v1615_v22 = vpack.c.bf16 %v1704_v21, %v1702_v18  ;;  %v490_v24 = vpack.c.bf16 %v1704_v21, %v1704_v21 }
 0x202   :  { %v692_v26 = vpop.f32.mrf.mxu2  ;;  %1705 = vtanh.f32 %v425_v25 }
 0x203   :  { %1635 = vst [vmem:[%s2425_s7 + $0x70] sm:$0xff] %v1615_v22   ;;  %v693_v27 = vadd.f32 %v2154_v49, %v692_v26  ;;  %v573_v29 = vunpack.c.l.b16 %v490_v24 }
 0x205   :  { %v756_v31 = vmax.f32 %v693_v27, 0.0  ;;  %v590_v32 = vpack.c.b16 %v573_v29, %v572_v28 }
 0x207   :  { %v782_v33 = vpack.c.bf16 %v756_v31, %v755_v30  ;;  %v426_v34 = vpop.f32.mrf.mxu1  ;;  %734 = vmatmul.bf16.gmra.mxu2 %v590_v32 }
 0x208   :  { %v427_v35 = vadd.f32 %v2056_v62, %v426_v34  ;;  %v1706_v37 = vpop.eup %1705 }
 0x209   :  { %1501 = vmatmul.msk.bf16.gmra.mxu3 %vm291_vm2, %v782_v33  ;;  %1517 = vmatmul.msk.bf16.gmra.mxu0 %vm291_vm2, %v782_v33  ;;  %v491_v38 = vpack.c.bf16 %v1706_v37, %v1706_v37 }
 0x20a   :  { %1707 = vtanh.f32 %v427_v35  ;;  %v695_v36 = vpop.f32.mrf.mxu2 }
 0x20b   :  { %v696_v42 = vadd.f32 %v2154_v49, %v695_v36  ;;  %v574_v45 = vunpack.c.l.b16 %v491_v38 }
 0x20d   :  { %v757_v47 = vmax.f32 %v696_v42, 0.0 }
 0x210   :  { %v1708_v39 = vpop.eup %1707 }
 0x211   :  { %v1620_v41 = vpack.c.bf16 %v1708_v39, %v1706_v37  ;;  %v492_v43 = vpack.c.bf16 %v1708_v39, %v1708_v39 }
 0x212   :  { %v697_v44 = vpop.f32.mrf.mxu2 }
 0x213   :  { %1636 = vst [vmem:[%s2425_s7 + $0x78] sm:$0xff] %v1620_v41   ;;  %v698_v62 = vadd.f32 %v2154_v49, %v697_v44  ;;  %v575_v46 = vunpack.c.l.b16 %v492_v43 }
 0x215   :  { %v758_v48 = vmax.f32 %v698_v62, 0.0  ;;  %v591_v50 = vpack.c.b16 %v575_v46, %v574_v45 }
 0x217   :  { %v783_v51 = vpack.c.bf16 %v758_v48, %v757_v47  ;;  %739 = vmatmul.bf16.gmra.mxu2 %v591_v50 }
 0x219   :  { %1502 = vmatmul.msk.bf16.gmra.mxu3 %vm291_vm2, %v783_v51  ;;  %1518 = vmatmul.msk.bf16.gmra.mxu0 %vm291_vm2, %v783_v51 }
 0x21a   :  { %v700_v52 = vpop.f32.mrf.mxu2 }
 0x21b   :  { %v701_v53 = vadd.f32 %v2154_v49, %v700_v52 }
 0x21d   :  { %v759_v56 = vmax.f32 %v701_v53, 0.0 }
 0x222   :  { %v702_v54 = vpop.f32.mrf.mxu2 }
 0x223   :  { %v703_v55 = vadd.f32 %v2154_v49, %v702_v54 }
 0x225   :  { %v760_v57 = vmax.f32 %v703_v55, 0.0 }
 0x227   :  { %v784_v58 = vpack.c.bf16 %v760_v57, %v759_v56 }
 0x229   :  { %1503 = vmatmul.msk.bf16.gmra.mxu3 %vm291_vm2, %v784_v58  ;;  %1519 = vmatmul.msk.bf16.gmra.mxu0 %vm291_vm2, %v784_v58 }
 0x22a   :  { %v705_v59 = vpop.f32.mrf.mxu2 }
 0x22b   :  { %v706_v61 = vadd.f32 %v2154_v49, %v705_v59 }
 0x22d   :  { %v761_v2 = vmax.f32 %v706_v61, 0.0 }
 0x232   :  { %v707_v63 = vpop.f32.mrf.mxu2 }
 0x233   :  { %v708_v0 = vadd.f32 %v2154_v49, %v707_v63 }
 0x235   :  { %v762_v3 = vmax.f32 %v708_v0, 0.0 }
 0x236   :  { %v968_v4 = vpop.f32.mrf.mxu0 }
 0x237   :  { %v785_v5 = vpack.c.bf16 %v762_v3, %v761_v2  ;;  %v969_v6 = vadd.f32 %v968_v4, %v2226_v1 }
 0x239   :  { %v1049_v7 = vmul.f32 0.5, %v969_v6  ;;  %1504 = vmatmul.msk.bf16.gmra.mxu3 %vm291_vm2, %v785_v5  ;;  %1520 = vmatmul.msk.bf16.gmra.mxu0 %vm291_vm2, %v785_v5 }
 0x23a   :  { %v710_v9 = vpop.f32.mrf.mxu2 }
 0x23b   :  { %1709 = vtanh.f32 %v1049_v7  ;;  %v711_v14 = vadd.f32 %v2154_v49, %v710_v9 }
 0x23c   :  { %v879_v10 = vpop.f32.mrf.mxu3 }
 0x23d   :  { %v880_v11 = vadd.f32 %v879_v10, %v2231_v8  ;;  %v763_v20 = vmax.f32 %v711_v14, 0.0 }
 0x23e   :  { %v970_v40 = vpop.f32.mrf.mxu0 }
 0x23f   :  { %v1048_v12 = vmul.f32 0.5, %v880_v11  ;;  %v971_v13 = vadd.f32 %v970_v40, %v2226_v1 }
 0x241   :  { %1711 = vtanh.f32 %v1048_v12  ;;  %v1051_v15 = vmul.f32 0.5, %v971_v13  ;;  %v1710_v17 = vpop.eup %1709 }
 0x242   :  { %v712_v16 = vpop.f32.mrf.mxu2  ;;  %v1177_v23 = vmul.f32 0.5, %v1710_v17 }
 0x243   :  { %v713_v18 = vadd.f32 %v2154_v49, %v712_v16  ;;  %1713 = vtanh.f32 %v1051_v15 }
 0x244   :  { %v881_v19 = vpop.f32.mrf.mxu3  ;;  %v1241_v31 = vadd.f32 0.5, %v1177_v23 }
 0x245   :  { %v764_v21 = vmax.f32 %v713_v18, 0.0  ;;  %v882_v22 = vadd.f32 %v881_v19, %v2231_v8 }
 0x246   :  { %v973_v24 = vpop.f32.mrf.mxu0 }
 0x247   :  { %v1712_v25 = vpop.eup %1711  ;;  %v786_v26 = vpack.c.bf16 %v764_v21, %v763_v20  ;;  %v1050_v27 = vmul.f32 0.5, %v882_v22  ;;  %v974_v28 = vadd.f32 %v973_v24, %v2226_v1 }
 0x248   :  { %v1176_v29 = vmul.f32 0.5, %v1712_v25 }
 0x249   :  { %1715 = vtanh.f32 %v1050_v27  ;;  %v1053_v30 = vmul.f32 0.5, %v974_v28  ;;  %1505 = vmatmul.msk.bf16.gmra.mxu3 %vm291_vm2, %v786_v26  ;;  %1521 = vmatmul.msk.bf16.gmra.mxu0 %vm291_vm2, %v786_v26  ;;  %v1714_v34 = vpop.eup %1713 }
 0x24a   :  { %v1240_v32 = vadd.f32 0.5, %v1176_v29  ;;  %v715_v33 = vpop.f32.mrf.mxu2  ;;  %v1179_v38 = vmul.f32 0.5, %v1714_v34 }
 0x24b   :  { %1717 = vtanh.f32 %v1053_v30  ;;  %v716_v62 = vadd.f32 %v2154_v49, %v715_v33 }
 0x24c   :  { %v1336_v35 = vpack.c.bf16 %v1241_v31, %v1240_v32  ;;  %v884_v36 = vpop.f32.mrf.mxu3  ;;  %v1243_v46 = vadd.f32 0.5, %v1179_v38 }
 0x24d   :  { %v885_v37 = vadd.f32 %v884_v36, %v2231_v8  ;;  %v765_v54 = vmax.f32 %v716_v62, 0.0 }
 0x24e   :  { %1368 = vst [vmem:[%s2427_s6] sm:$0xff] %v1336_v35  ;;  %v975_v39 = vpop.f32.mrf.mxu0 }
 0x24f   :  { %v1716_v41 = vpop.eup %1715  ;;  %v1052_v42 = vmul.f32 0.5, %v885_v37  ;;  %v976_v43 = vadd.f32 %v975_v39, %v2226_v1 }
 0x250   :  { %v1178_v44 = vmul.f32 0.5, %v1716_v41 }
 0x251   :  { %1719 = vtanh.f32 %v1052_v42  ;;  %v1055_v45 = vmul.f32 0.5, %v976_v43  ;;  %v1718_v50 = vpop.eup %1717 }
 0x252   :  { %v1242_v47 = vadd.f32 0.5, %v1178_v44  ;;  %v717_v48 = vpop.f32.mrf.mxu2  ;;  %v1181_v57 = vmul.f32 0.5, %v1718_v50 }
 0x253   :  { %v718_v51 = vadd.f32 %v2154_v49, %v717_v48  ;;  %1721 = vtanh.f32 %v1055_v45 }
 0x254   :  { %v1337_v52 = vpack.c.bf16 %v1243_v46, %v1242_v47  ;;  %v886_v53 = vpop.f32.mrf.mxu3  ;;  %v1245_v3 = vadd.f32 0.5, %v1181_v57 }
 0x255   :  { %v766_v55 = vmax.f32 %v718_v51, 0.0  ;;  %v887_v56 = vadd.f32 %v886_v53, %v2231_v8 }
 0x256   :  { %1369 = vst [vmem:[%s2427_s6 + $0x8] sm:$0xff] %v1337_v52  ;;  %v978_v58 = vpop.f32.mrf.mxu0 }
 0x257   :  { %v1720_v59 = vpop.eup %1719  ;;  %v787_v60 = vpack.c.bf16 %v766_v55, %v765_v54  ;;  %v1054_v61 = vmul.f32 0.5, %v887_v56  ;;  %v979_v63 = vadd.f32 %v978_v58, %v2226_v1 }
 0x258   :  { %v1180_v0 = vmul.f32 0.5, %v1720_v59 }
 0x259   :  { %1723 = vtanh.f32 %v1054_v61  ;;  %v1057_v2 = vmul.f32 0.5, %v979_v63  ;;  %1506 = vmatmul.msk.bf16.gmra.mxu3 %vm291_vm2, %v787_v60  ;;  %1522 = vmatmul.msk.bf16.gmra.mxu0 %vm291_vm2, %v787_v60  ;;  %v1722_v6 = vpop.eup %1721 }
 0x25a   :  { %v1244_v4 = vadd.f32 0.5, %v1180_v0  ;;  %v720_v5 = vpop.f32.mrf.mxu2  ;;  %v1183_v11 = vmul.f32 0.5, %v1722_v6 }
 0x25b   :  { %1725 = vtanh.f32 %v1057_v2  ;;  %v721_v16 = vadd.f32 %v2154_v49, %v720_v5 }
 0x25c   :  { %v1338_v7 = vpack.c.bf16 %v1245_v3, %v1244_v4  ;;  %v889_v9 = vpop.f32.mrf.mxu3  ;;  %v1247_v18 = vadd.f32 0.5, %v1183_v11 }
 0x25d   :  { %v890_v10 = vadd.f32 %v889_v9, %v2231_v8  ;;  %v767_v25 = vmax.f32 %v721_v16, 0.0 }
 0x25e   :  { %1370 = vst [vmem:[%s2427_s6 + $0x10] sm:$0xff] %v1338_v7  ;;  %v980_v40 = vpop.f32.mrf.mxu0 }
 0x25f   :  { %v1724_v12 = vpop.eup %1723  ;;  %v1056_v13 = vmul.f32 0.5, %v890_v10  ;;  %v981_v14 = vadd.f32 %v980_v40, %v2226_v1 }
 0x260   :  { %v1182_v15 = vmul.f32 0.5, %v1724_v12 }
 0x261   :  { %1727 = vtanh.f32 %v1056_v13  ;;  %v1059_v17 = vmul.f32 0.5, %v981_v14  ;;  %v1726_v21 = vpop.eup %1725 }
 0x262   :  { %v1246_v19 = vadd.f32 0.5, %v1182_v15  ;;  %v722_v20 = vpop.f32.mrf.mxu2  ;;  %v1185_v28 = vmul.f32 0.5, %v1726_v21 }
 0x263   :  { %v723_v22 = vadd.f32 %v2154_v49, %v722_v20  ;;  %1729 = vtanh.f32 %v1059_v17 }
 0x264   :  { %v1339_v23 = vpack.c.bf16 %v1247_v18, %v1246_v19  ;;  %v891_v24 = vpop.f32.mrf.mxu3  ;;  %v1249_v36 = vadd.f32 0.5, %v1185_v28 }
 0x265   :  { %v768_v26 = vmax.f32 %v723_v22, 0.0  ;;  %v892_v27 = vadd.f32 %v891_v24, %v2231_v8 }
 0x266   :  { %1371 = vst [vmem:[%s2427_s6 + $0x18] sm:$0xff] %v1339_v23  ;;  %v983_v29 = vpop.f32.mrf.mxu0 }
 0x267   :  { %v1728_v30 = vpop.eup %1727  ;;  %v788_v31 = vpack.c.bf16 %v768_v26, %v767_v25  ;;  %v1058_v32 = vmul.f32 0.5, %v892_v27  ;;  %v984_v33 = vadd.f32 %v983_v29, %v2226_v1 }
 0x268   :  { %v1184_v34 = vmul.f32 0.5, %v1728_v30 }
 0x269   :  { %1731 = vtanh.f32 %v1058_v32  ;;  %v1061_v35 = vmul.f32 0.5, %v984_v33  ;;  %1507 = vmatmul.msk.bf16.gmra.mxu3 %vm291_vm2, %v788_v31  ;;  %1523 = vmatmul.msk.bf16.gmra.mxu0 %vm291_vm2, %v788_v31  ;;  %v1730_v39 = vpop.eup %1729 }
 0x26a   :  { %v1248_v37 = vadd.f32 0.5, %v1184_v34  ;;  %v725_v38 = vpop.f32.mrf.mxu2  ;;  %v1187_v44 = vmul.f32 0.5, %v1730_v39 }
 0x26b   :  { %1733 = vtanh.f32 %v1061_v35  ;;  %v726_v50 = vadd.f32 %v2154_v49, %v725_v38 }
 0x26c   :  { %v1340_v41 = vpack.c.bf16 %v1249_v36, %v1248_v37  ;;  %v894_v42 = vpop.f32.mrf.mxu3  ;;  %v1251_v52 = vadd.f32 0.5, %v1187_v44 }
 0x26d   :  { %v895_v43 = vadd.f32 %v894_v42, %v2231_v8  ;;  %v769_v59 = vmax.f32 %v726_v50, 0.0 }
 0x26e   :  { %1372 = vst [vmem:[%s2427_s6 + $0x20] sm:$0xff] %v1340_v41  ;;  %v985_v62 = vpop.f32.mrf.mxu0 }
 0x26f   :  { %v1732_v45 = vpop.eup %1731  ;;  %v1060_v46 = vmul.f32 0.5, %v895_v43  ;;  %v986_v47 = vadd.f32 %v985_v62, %v2226_v1 }
 0x270   :  { %v1186_v48 = vmul.f32 0.5, %v1732_v45 }
 0x271   :  { %1735 = vtanh.f32 %v1060_v46  ;;  %v1063_v51 = vmul.f32 0.5, %v986_v47  ;;  %v1734_v55 = vpop.eup %1733 }
 0x272   :  { %v1250_v53 = vadd.f32 0.5, %v1186_v48  ;;  %v727_v54 = vpop.f32.mrf.mxu2  ;;  %v1189_v63 = vmul.f32 0.5, %v1734_v55 }
 0x273   :  { %v728_v56 = vadd.f32 %v2154_v49, %v727_v54  ;;  %1737 = vtanh.f32 %v1063_v51 }
 0x274   :  { %v1341_v57 = vpack.c.bf16 %v1251_v52, %v1250_v53  ;;  %v896_v58 = vpop.f32.mrf.mxu3  ;;  %v1253_v9 = vadd.f32 0.5, %v1189_v63 }
 0x275   :  { %v770_v60 = vmax.f32 %v728_v56, 0.0  ;;  %v897_v61 = vadd.f32 %v896_v58, %v2231_v8 }
 0x276   :  { %1373 = vst [vmem:[%s2427_s6 + $0x28] sm:$0xff] %v1341_v57  ;;  %v988_v0 = vpop.f32.mrf.mxu0 }
 0x277   :  { %v1736_v2 = vpop.eup %1735  ;;  %v789_v3 = vpack.c.bf16 %v770_v60, %v769_v59  ;;  %v1062_v4 = vmul.f32 0.5, %v897_v61  ;;  %v989_v5 = vadd.f32 %v988_v0, %v2226_v1 }
 0x278   :  { %v1188_v6 = vmul.f32 0.5, %v1736_v2 }
 0x279   :  { %1739 = vtanh.f32 %v1062_v4  ;;  %v1065_v7 = vmul.f32 0.5, %v989_v5  ;;  %1508 = vmatmul.msk.bf16.gmra.mxu3 %vm291_vm2, %v789_v3  ;;  %1524 = vmatmul.msk.bf16.gmra.mxu0 %vm291_vm2, %v789_v3  ;;  %v1738_v40 = vpop.eup %1737 }
 0x27a   :  { %v1252_v10 = vadd.f32 0.5, %v1188_v6  ;;  %v730_v11 = vpop.f32.mrf.mxu2  ;;  %v1191_v15 = vmul.f32 0.5, %v1738_v40 }
 0x27b   :  { %1741 = vtanh.f32 %v1065_v7  ;;  %v731_v21 = vadd.f32 %v2154_v49, %v730_v11 }
 0x27c   :  { %v1342_v12 = vpack.c.bf16 %v1253_v9, %v1252_v10  ;;  %v899_v13 = vpop.f32.mrf.mxu3  ;;  %v1255_v23 = vadd.f32 0.5, %v1191_v15 }
 0x27d   :  { %v900_v14 = vadd.f32 %v899_v13, %v2231_v8  ;;  %v771_v30 = vmax.f32 %v731_v21, 0.0 }
 0x27e   :  { %1374 = vst [vmem:[%s2427_s6 + $0x30] sm:$0xff] %v1342_v12  ;;  %v990_v16 = vpop.f32.mrf.mxu0 }
 0x27f   :  { %v1740_v17 = vpop.eup %1739  ;;  %v1064_v18 = vmul.f32 0.5, %v900_v14  ;;  %v991_v19 = vadd.f32 %v990_v16, %v2226_v1 }
 0x280   :  { %v1190_v20 = vmul.f32 0.5, %v1740_v17 }
 0x281   :  { %1743 = vtanh.f32 %v1064_v18  ;;  %v1067_v22 = vmul.f32 0.5, %v991_v19  ;;  %v1742_v26 = vpop.eup %1741 }
 0x282   :  { %v1254_v24 = vadd.f32 0.5, %v1190_v20  ;;  %v732_v25 = vpop.f32.mrf.mxu2  ;;  %v1193_v33 = vmul.f32 0.5, %v1742_v26 }
 0x283   :  { %v733_v27 = vadd.f32 %v2154_v49, %v732_v25  ;;  %1745 = vtanh.f32 %v1067_v22 }
 0x284   :  { %v1343_v28 = vpack.c.bf16 %v1255_v23, %v1254_v24  ;;  %v901_v29 = vpop.f32.mrf.mxu3  ;;  %v1257_v42 = vadd.f32 0.5, %v1193_v33 }
 0x285   :  { %v772_v31 = vmax.f32 %v733_v27, 0.0  ;;  %v902_v32 = vadd.f32 %v901_v29, %v2231_v8 }
 0x286   :  { %1375 = vst [vmem:[%s2427_s6 + $0x38] sm:$0xff] %v1343_v28  ;;  %v993_v34 = vpop.f32.mrf.mxu0 }
 0x287   :  { %v1744_v35 = vpop.eup %1743  ;;  %v790_v36 = vpack.c.bf16 %v772_v31, %v771_v30  ;;  %v1066_v37 = vmul.f32 0.5, %v902_v32  ;;  %v994_v38 = vadd.f32 %v993_v34, %v2226_v1 }
 0x288   :  { %v1192_v39 = vmul.f32 0.5, %v1744_v35 }
 0x289   :  { %1747 = vtanh.f32 %v1066_v37  ;;  %v1069_v41 = vmul.f32 0.5, %v994_v38  ;;  %1509 = vmatmul.msk.bf16.gmra.mxu3 %vm291_vm2, %v790_v36  ;;  %1525 = vmatmul.msk.bf16.gmra.mxu0 %vm291_vm2, %v790_v36  ;;  %v1746_v62 = vpop.eup %1745 }
 0x28a   :  { %v1256_v43 = vadd.f32 0.5, %v1192_v39  ;;  %v735_v44 = vpop.f32.mrf.mxu2  ;;  %v1195_v48 = vmul.f32 0.5, %v1746_v62 }
 0x28b   :  { %1749 = vtanh.f32 %v1069_v41  ;;  %v736_v55 = vadd.f32 %v2154_v49, %v735_v44 }
 0x28c   :  { %v1344_v45 = vpack.c.bf16 %v1257_v42, %v1256_v43  ;;  %v904_v46 = vpop.f32.mrf.mxu3  ;;  %v1259_v57 = vadd.f32 0.5, %v1195_v48 }
 0x28d   :  { %v905_v47 = vadd.f32 %v904_v46, %v2231_v8  ;;  %v773_v2 = vmax.f32 %v736_v55, 0.0 }
 0x28e   :  { %1376 = vst [vmem:[%s2427_s6 + $0x40] sm:$0xff] %v1344_v45  ;;  %v995_v50 = vpop.f32.mrf.mxu0 }
 0x28f   :  { %v1748_v51 = vpop.eup %1747  ;;  %v1068_v52 = vmul.f32 0.5, %v905_v47  ;;  %v996_v53 = vadd.f32 %v995_v50, %v2226_v1 }
 0x290   :  { %v1194_v54 = vmul.f32 0.5, %v1748_v51 }
 0x291   :  { %1751 = vtanh.f32 %v1068_v52  ;;  %v1071_v56 = vmul.f32 0.5, %v996_v53  ;;  %v1750_v60 = vpop.eup %1749 }
 0x292   :  { %v1258_v58 = vadd.f32 0.5, %v1194_v54  ;;  %v737_v59 = vpop.f32.mrf.mxu2  ;;  %v1197_v5 = vmul.f32 0.5, %v1750_v60 }
 0x293   :  { %v738_v61 = vadd.f32 %v2154_v49, %v737_v59  ;;  %1753 = vtanh.f32 %v1071_v56 }
 0x294   :  { %v1345_v63 = vpack.c.bf16 %v1259_v57, %v1258_v58  ;;  %v906_v0 = vpop.f32.mrf.mxu3  ;;  %v1261_v13 = vadd.f32 0.5, %v1197_v5 }
 0x295   :  { %v774_v3 = vmax.f32 %v738_v61, 0.0  ;;  %v907_v4 = vadd.f32 %v906_v0, %v2231_v8 }
 0x296   :  { %1377 = vst [vmem:[%s2427_s6 + $0x48] sm:$0xff] %v1345_v63  ;;  %v998_v6 = vpop.f32.mrf.mxu0 }
 0x297   :  { %v1752_v7 = vpop.eup %1751  ;;  %v791_v9 = vpack.c.bf16 %v774_v3, %v773_v2  ;;  %v1070_v10 = vmul.f32 0.5, %v907_v4  ;;  %v999_v11 = vadd.f32 %v998_v6, %v2226_v1 }
 0x298   :  { %v1196_v40 = vmul.f32 0.5, %v1752_v7 }
 0x299   :  { %1755 = vtanh.f32 %v1070_v10  ;;  %v1073_v12 = vmul.f32 0.5, %v999_v11  ;;  %1510 = vmatmul.msk.bf16.gmra.mxu3 %vm291_vm2, %v791_v9  ;;  %1526 = vmatmul.msk.bf16.gmra.mxu0 %vm291_vm2, %v791_v9  ;;  %v1754_v16 = vpop.eup %1753 }
 0x29a   :  { %v1260_v14 = vadd.f32 0.5, %v1196_v40  ;;  %v740_v15 = vpop.f32.mrf.mxu2  ;;  %v1199_v20 = vmul.f32 0.5, %v1754_v16 }
 0x29b   :  { %1757 = vtanh.f32 %v1073_v12  ;;  %v741_v26 = vadd.f32 %v2154_v49, %v740_v15 }
 0x29c   :  { %v1346_v17 = vpack.c.bf16 %v1261_v13, %v1260_v14  ;;  %v909_v18 = vpop.f32.mrf.mxu3  ;;  %v1263_v28 = vadd.f32 0.5, %v1199_v20 }
 0x29d   :  { %v910_v19 = vadd.f32 %v909_v18, %v2231_v8  ;;  %v775_v35 = vmax.f32 %v741_v26, 0.0 }
 0x29e   :  { %1378 = vst [vmem:[%s2427_s6 + $0x50] sm:$0xff] %v1346_v17  ;;  %v1000_v21 = vpop.f32.mrf.mxu0 }
 0x29f   :  { %v1756_v22 = vpop.eup %1755  ;;  %v1072_v23 = vmul.f32 0.5, %v910_v19  ;;  %v1001_v24 = vadd.f32 %v1000_v21, %v2226_v1 }
 0x2a0   :  { %v1198_v25 = vmul.f32 0.5, %v1756_v22 }
 0x2a1   :  { %1759 = vtanh.f32 %v1072_v23  ;;  %v1075_v27 = vmul.f32 0.5, %v1001_v24  ;;  %v1758_v31 = vpop.eup %1757 }
 0x2a2   :  { %v1262_v29 = vadd.f32 0.5, %v1198_v25  ;;  %v742_v30 = vpop.f32.mrf.mxu2  ;;  %v1201_v38 = vmul.f32 0.5, %v1758_v31 }
 0x2a3   :  { %v743_v32 = vadd.f32 %v2154_v49, %v742_v30  ;;  %1761 = vtanh.f32 %v1075_v27 }
 0x2a4   :  { %v1347_v33 = vpack.c.bf16 %v1263_v28, %v1262_v29  ;;  %v911_v34 = vpop.f32.mrf.mxu3  ;;  %v1265_v45 = vadd.f32 0.5, %v1201_v38 }
 0x2a5   :  { %v776_v36 = vmax.f32 %v743_v32, 0.0  ;;  %v912_v37 = vadd.f32 %v911_v34, %v2231_v8 }
 0x2a6   :  { %1379 = vst [vmem:[%s2427_s6 + $0x58] sm:$0xff] %v1347_v33  ;;  %v1003_v39 = vpop.f32.mrf.mxu0 }
 0x2a7   :  { %v1760_v41 = vpop.eup %1759  ;;  %v792_v42 = vpack.c.bf16 %v776_v36, %v775_v35  ;;  %v1074_v43 = vmul.f32 0.5, %v912_v37  ;;  %v1004_v44 = vadd.f32 %v1003_v39, %v2226_v1 }
 0x2a8   :  { %v1200_v62 = vmul.f32 0.5, %v1760_v41 }
 0x2a9   :  { %1763 = vtanh.f32 %v1074_v43  ;;  %v1077_v49 = vmul.f32 0.5, %v1004_v44  ;;  %1511 = vmatmul.msk.bf16.gmra.mxu3 %vm291_vm2, %v792_v42  ;;  %1527 = vmatmul.msk.bf16.vlgmr.msra.gmra.mxu2 %vm291_vm2, %v792_v42  ;;  %v1762_v47 = vpop.eup %1761 }
 0x2aa   :  { %v1264_v46 = vadd.f32 0.5, %v1200_v62  ;;  %v1203_v52 = vmul.f32 0.5, %v1762_v47 }
 0x2ab   :  { %1765 = vtanh.f32 %v1077_v49 }
 0x2ac   :  { %v1348_v48 = vpack.c.bf16 %v1265_v45, %v1264_v46  ;;  %v914_v50 = vpop.f32.mrf.mxu3  ;;  %v1267_v59 = vadd.f32 0.5, %v1203_v52 }
 0x2ad   :  { %v915_v51 = vadd.f32 %v914_v50, %v2231_v8 }
 0x2ae   :  { %1380 = vst [vmem:[%s2427_s6 + $0x60] sm:$0xff] %v1348_v48  ;;  %v1005_v53 = vpop.f32.mrf.mxu0 }
 0x2af   :  { %v1764_v54 = vpop.eup %1763  ;;  %v1076_v55 = vmul.f32 0.5, %v915_v51  ;;  %v1006_v56 = vadd.f32 %v1005_v53, %v2226_v1 }
 0x2b0   :  { %v1202_v57 = vmul.f32 0.5, %v1764_v54 }
 0x2b1   :  { %1767 = vtanh.f32 %v1076_v55  ;;  %v1079_v58 = vmul.f32 0.5, %v1006_v56  ;;  %v1766_v61 = vpop.eup %1765 }
 0x2b2   :  { %v1266_v60 = vadd.f32 0.5, %v1202_v57  ;;  %v1205_v3 = vmul.f32 0.5, %v1766_v61 }
 0x2b3   :  { %1769 = vtanh.f32 %v1079_v58 }
 0x2b4   :  { %v1349_v63 = vpack.c.bf16 %v1267_v59, %v1266_v60  ;;  %v916_v0 = vpop.f32.mrf.mxu3  ;;  %v1269_v11 = vadd.f32 0.5, %v1205_v3 }
 0x2b5   :  { %v917_v2 = vadd.f32 %v916_v0, %v2231_v8 }
 0x2b6   :  { %1381 = vst [vmem:[%s2427_s6 + $0x68] sm:$0xff] %v1349_v63  ;;  %v1008_v4 = vpop.f32.mrf.mxu0 }
 0x2b7   :  { %v1768_v5 = vpop.eup %1767  ;;  %v1078_v6 = vmul.f32 0.5, %v917_v2  ;;  %v1009_v7 = vadd.f32 %v1008_v4, %v2226_v1 }
 0x2b8   :  { %v1204_v9 = vmul.f32 0.5, %v1768_v5 }
 0x2b9   :  { %1771 = vtanh.f32 %v1078_v6  ;;  %v1081_v10 = vmul.f32 0.5, %v1009_v7  ;;  %v1770_v12 = vpop.eup %1769 }
 0x2ba   :  { %v1268_v40 = vadd.f32 0.5, %v1204_v9  ;;  %v1207_v16 = vmul.f32 0.5, %v1770_v12 }
 0x2bb   :  { %1773 = vtanh.f32 %v1081_v10 }
 0x2bc   :  { %v1350_v13 = vpack.c.bf16 %v1269_v11, %v1268_v40  ;;  %v919_v14 = vpop.f32.mrf.mxu3  ;;  %v1271_v23 = vadd.f32 0.5, %v1207_v16 }
 0x2bd   :  { %v920_v15 = vadd.f32 %v919_v14, %v2231_v8 }
 0x2be   :  { %1382 = vst [vmem:[%s2427_s6 + $0x70] sm:$0xff] %v1350_v13  ;;  %v1010_v17 = vpop.f32.mrf.mxu0 }
 0x2bf   :  { %v1772_v18 = vpop.eup %1771  ;;  %v1080_v19 = vmul.f32 0.5, %v920_v15  ;;  %v1011_v20 = vadd.f32 %v1010_v17, %v2226_v1 }
 0x2c0   :  { %v1206_v21 = vmul.f32 0.5, %v1772_v18 }
 0x2c1   :  { %1775 = vtanh.f32 %v1080_v19  ;;  %v1083_v22 = vmul.f32 0.5, %v1011_v20  ;;  %v1774_v25 = vpop.eup %1773 }
 0x2c2   :  { %v1270_v24 = vadd.f32 0.5, %v1206_v21  ;;  %v1209_v29 = vmul.f32 0.5, %v1774_v25 }
 0x2c3   :  { %1777 = vtanh.f32 %v1083_v22 }
 0x2c4   :  { %v1351_v26 = vpack.c.bf16 %v1271_v23, %v1270_v24  ;;  %v921_v27 = vpop.f32.mrf.mxu3  ;;  %v1273_v36 = vadd.f32 0.5, %v1209_v29 }
 0x2c5   :  { %v922_v28 = vadd.f32 %v921_v27, %v2231_v8 }
 0x2c6   :  { %1383 = vst [vmem:[%s2427_s6 + $0x78] sm:$0xff] %v1351_v26  ;;  %v1013_v30 = vpop.f32.mrf.mxu0 }
 0x2c7   :  { %v1776_v31 = vpop.eup %1775  ;;  %v1082_v32 = vmul.f32 0.5, %v922_v28  ;;  %v1014_v33 = vadd.f32 %v1013_v30, %v2226_v1 }
 0x2c8   :  { %v1208_v34 = vmul.f32 0.5, %v1776_v31 }
 0x2c9   :  { %1779 = vtanh.f32 %v1082_v32  ;;  %v1085_v35 = vmul.f32 0.5, %v1014_v33  ;;  %v1778_v38 = vpop.eup %1777 }
 0x2ca   :  { %v1272_v37 = vadd.f32 0.5, %v1208_v34  ;;  %v1211_v43 = vmul.f32 0.5, %v1778_v38 }
 0x2cb   :  { %1781 = vtanh.f32 %v1085_v35 }
 0x2cc   :  { %v1352_v39 = vpack.c.bf16 %v1273_v36, %v1272_v37  ;;  %v924_v41 = vpop.f32.mrf.mxu3  ;;  %v1275_v48 = vadd.f32 0.5, %v1211_v43 }
 0x2cd   :  { %v925_v42 = vadd.f32 %v924_v41, %v2231_v8 }
 0x2ce   :  { %1384 = vst [vmem:[%s2427_s6 + $0x80] sm:$0xff] %v1352_v39  ;;  %v1015_v44 = vpop.f32.mrf.mxu0 }
 0x2cf   :  { %v1780_v62 = vpop.eup %1779  ;;  %v1084_v49 = vmul.f32 0.5, %v925_v42  ;;  %v1016_v45 = vadd.f32 %v1015_v44, %v2226_v1 }
 0x2d0   :  { %v1210_v46 = vmul.f32 0.5, %v1780_v62 }
 0x2d1   :  { %1783 = vtanh.f32 %v1084_v49  ;;  %v1087_v47 = vmul.f32 0.5, %v1016_v45  ;;  %v1782_v51 = vpop.eup %1781 }
 0x2d2   :  { %v1274_v50 = vadd.f32 0.5, %v1210_v46  ;;  %v1213_v55 = vmul.f32 0.5, %v1782_v51 }
 0x2d3   :  { %1785 = vtanh.f32 %v1087_v47 }
 0x2d4   :  { %v1353_v52 = vpack.c.bf16 %v1275_v48, %v1274_v50  ;;  %v926_v53 = vpop.f32.mrf.mxu3  ;;  %v1277_v63 = vadd.f32 0.5, %v1213_v55 }
 0x2d5   :  { %v927_v54 = vadd.f32 %v926_v53, %v2231_v8 }
 0x2d6   :  { %1385 = vst [vmem:[%s2427_s6 + $0x88] sm:$0xff] %v1353_v52  ;;  %v1018_v56 = vpop.f32.mrf.mxu0 }
 0x2d7   :  { %v1784_v57 = vpop.eup %1783  ;;  %v1086_v58 = vmul.f32 0.5, %v927_v54  ;;  %v1019_v59 = vadd.f32 %v1018_v56, %v2226_v1 }
 0x2d8   :  { %v1212_v60 = vmul.f32 0.5, %v1784_v57 }
 0x2d9   :  { %1787 = vtanh.f32 %v1086_v58  ;;  %v1089_v61 = vmul.f32 0.5, %v1019_v59  ;;  %v1786_v2 = vpop.eup %1785 }
 0x2da   :  { %v1276_v0 = vadd.f32 0.5, %v1212_v60  ;;  %v1215_v6 = vmul.f32 0.5, %v1786_v2 }
 0x2db   :  { %1789 = vtanh.f32 %v1089_v61 }
 0x2dc   :  { %v1354_v3 = vpack.c.bf16 %v1277_v63, %v1276_v0  ;;  %v929_v4 = vpop.f32.mrf.mxu3  ;;  %v1279_v13 = vadd.f32 0.5, %v1215_v6 }
 0x2dd   :  { %v930_v5 = vadd.f32 %v929_v4, %v2231_v8 }
 0x2de   :  { %1386 = vst [vmem:[%s2427_s6 + $0x90] sm:$0xff] %v1354_v3  ;;  %v1020_v7 = vpop.f32.mrf.mxu0 }
 0x2df   :  { %v1788_v9 = vpop.eup %1787  ;;  %v1088_v10 = vmul.f32 0.5, %v930_v5  ;;  %v1021_v11 = vadd.f32 %v1020_v7, %v2226_v1 }
 0x2e0   :  { %v1214_v40 = vmul.f32 0.5, %v1788_v9 }
 0x2e1   :  { %1791 = vtanh.f32 %v1088_v10  ;;  %v1091_v12 = vmul.f32 0.5, %v1021_v11  ;;  %v1790_v15 = vpop.eup %1789 }
 0x2e2   :  { %v1278_v14 = vadd.f32 0.5, %v1214_v40  ;;  %v1217_v19 = vmul.f32 0.5, %v1790_v15 }
 0x2e3   :  { %1793 = vtanh.f32 %v1091_v12 }
 0x2e4   :  { %v1355_v16 = vpack.c.bf16 %v1279_v13, %v1278_v14  ;;  %v931_v17 = vpop.f32.mrf.mxu3  ;;  %v1281_v26 = vadd.f32 0.5, %v1217_v19 }
 0x2e5   :  { %v932_v18 = vadd.f32 %v931_v17, %v2231_v8 }
 0x2e6   :  { %1387 = vst [vmem:[%s2427_s6 + $0x98] sm:$0xff] %v1355_v16  ;;  %v1023_v20 = vpop.f32.mrf.mxu0 }
 0x2e7   :  { %v1792_v21 = vpop.eup %1791  ;;  %v1090_v22 = vmul.f32 0.5, %v932_v18  ;;  %v1024_v23 = vadd.f32 %v1023_v20, %v2226_v1 }
 0x2e8   :  { %v1216_v24 = vmul.f32 0.5, %v1792_v21 }
 0x2e9   :  { %1795 = vtanh.f32 %v1090_v22  ;;  %v1093_v25 = vmul.f32 0.5, %v1024_v23  ;;  %v1794_v28 = vpop.eup %1793 }
 0x2ea   :  { %v1280_v27 = vadd.f32 0.5, %v1216_v24  ;;  %v1219_v32 = vmul.f32 0.5, %v1794_v28 }
 0x2eb   :  { %1797 = vtanh.f32 %v1093_v25 }
 0x2ec   :  { %v1356_v29 = vpack.c.bf16 %v1281_v26, %v1280_v27  ;;  %v934_v30 = vpop.f32.mrf.mxu3  ;;  %v1283_v39 = vadd.f32 0.5, %v1219_v32 }
 0x2ed   :  { %v935_v31 = vadd.f32 %v934_v30, %v2231_v8 }
 0x2ee   :  { %1388 = vst [vmem:[%s2427_s6 + $0xa0] sm:$0xff] %v1356_v29  ;;  %v1025_v33 = vpop.f32.mrf.mxu0 }
 0x2ef   :  { %v1796_v34 = vpop.eup %1795  ;;  %v1092_v35 = vmul.f32 0.5, %v935_v31  ;;  %v1026_v36 = vadd.f32 %v1025_v33, %v2226_v1 }
 0x2f0   :  { %v1218_v37 = vmul.f32 0.5, %v1796_v34 }
 0x2f1   :  { %1799 = vtanh.f32 %v1092_v35  ;;  %v1095_v38 = vmul.f32 0.5, %v1026_v36  ;;  %v1798_v42 = vpop.eup %1797 }
 0x2f2   :  { %v1282_v41 = vadd.f32 0.5, %v1218_v37  ;;  %v1221_v49 = vmul.f32 0.5, %v1798_v42 }
 0x2f3   :  { %1801 = vtanh.f32 %v1095_v38 }
 0x2f4   :  { %v1357_v43 = vpack.c.bf16 %v1283_v39, %v1282_v41  ;;  %v936_v44 = vpop.f32.mrf.mxu3  ;;  %v1285_v52 = vadd.f32 0.5, %v1221_v49 }
 0x2f5   :  { %v937_v62 = vadd.f32 %v936_v44, %v2231_v8 }
 0x2f6   :  { %1389 = vst [vmem:[%s2427_s6 + $0xa8] sm:$0xff] %v1357_v43  ;;  %v1028_v45 = vpop.f32.mrf.mxu0 }
 0x2f7   :  { %v1800_v46 = vpop.eup %1799  ;;  %v1094_v47 = vmul.f32 0.5, %v937_v62  ;;  %v1029_v48 = vadd.f32 %v1028_v45, %v2226_v1 }
 0x2f8   :  { %v1220_v50 = vmul.f32 0.5, %v1800_v46 }
 0x2f9   :  { %1803 = vtanh.f32 %v1094_v47  ;;  %v1097_v51 = vmul.f32 0.5, %v1029_v48  ;;  %v1802_v54 = vpop.eup %1801 }
 0x2fa   :  { %v1284_v53 = vadd.f32 0.5, %v1220_v50  ;;  %v1223_v58 = vmul.f32 0.5, %v1802_v54 }
 0x2fb   :  { %1805 = vtanh.f32 %v1097_v51 }
 0x2fc   :  { %v1358_v55 = vpack.c.bf16 %v1285_v52, %v1284_v53  ;;  %v939_v56 = vpop.f32.mrf.mxu3  ;;  %v1287_v3 = vadd.f32 0.5, %v1223_v58 }
 0x2fd   :  { %v940_v57 = vadd.f32 %v939_v56, %v2231_v8 }
 0x2fe   :  { %1390 = vst [vmem:[%s2427_s6 + $0xb0] sm:$0xff] %v1358_v55  ;;  %v1030_v59 = vpop.f32.mrf.mxu0 }
 0x2ff   :  { %v1804_v60 = vpop.eup %1803  ;;  %v1096_v61 = vmul.f32 0.5, %v940_v57  ;;  %v1031_v63 = vadd.f32 %v1030_v59, %v2226_v1 }
 0x300   :  { %v1222_v0 = vmul.f32 0.5, %v1804_v60 }
 0x301   :  { %1807 = vtanh.f32 %v1096_v61  ;;  %v1099_v2 = vmul.f32 0.5, %v1031_v63  ;;  %v1806_v5 = vpop.eup %1805 }
 0x302   :  { %v1286_v4 = vadd.f32 0.5, %v1222_v0  ;;  %v1225_v10 = vmul.f32 0.5, %v1806_v5 }
 0x303   :  { %1809 = vtanh.f32 %v1099_v2 }
 0x304   :  { %v1359_v6 = vpack.c.bf16 %v1287_v3, %v1286_v4  ;;  %v941_v7 = vpop.f32.mrf.mxu3  ;;  %v1289_v16 = vadd.f32 0.5, %v1225_v10 }
 0x305   :  { %v942_v9 = vadd.f32 %v941_v7, %v2231_v8 }
 0x306   :  { %1391 = vst [vmem:[%s2427_s6 + $0xb8] sm:$0xff] %v1359_v6  ;;  %v1033_v11 = vpop.f32.mrf.mxu0 }
 0x307   :  { %v1808_v40 = vpop.eup %1807  ;;  %v1098_v12 = vmul.f32 0.5, %v942_v9  ;;  %v1034_v13 = vadd.f32 %v1033_v11, %v2226_v1 }
 0x308   :  { %v1224_v14 = vmul.f32 0.5, %v1808_v40 }
 0x309   :  { %1811 = vtanh.f32 %v1098_v12  ;;  %v1101_v15 = vmul.f32 0.5, %v1034_v13  ;;  %v1810_v18 = vpop.eup %1809 }
 0x30a   :  { %v1288_v17 = vadd.f32 0.5, %v1224_v14  ;;  %v1227_v22 = vmul.f32 0.5, %v1810_v18 }
 0x30b   :  { %1813 = vtanh.f32 %v1101_v15 }
 0x30c   :  { %v1360_v19 = vpack.c.bf16 %v1289_v16, %v1288_v17  ;;  %v944_v20 = vpop.f32.mrf.mxu3  ;;  %v1291_v29 = vadd.f32 0.5, %v1227_v22 }
 0x30d   :  { %v945_v21 = vadd.f32 %v944_v20, %v2231_v8 }
 0x30e   :  { %1392 = vst [vmem:[%s2427_s6 + $0xc0] sm:$0xff] %v1360_v19  ;;  %v1035_v23 = vpop.f32.mrf.mxu0 }
 0x30f   :  { %v1812_v24 = vpop.eup %1811  ;;  %v1100_v25 = vmul.f32 0.5, %v945_v21  ;;  %v1036_v26 = vadd.f32 %v1035_v23, %v2226_v1 }
 0x310   :  { %v1226_v27 = vmul.f32 0.5, %v1812_v24 }
 0x311   :  { %1815 = vtanh.f32 %v1100_v25  ;;  %v1103_v28 = vmul.f32 0.5, %v1036_v26  ;;  %v1814_v31 = vpop.eup %1813 }
 0x312   :  { %v1290_v30 = vadd.f32 0.5, %v1226_v27  ;;  %v1229_v35 = vmul.f32 0.5, %v1814_v31 }
 0x313   :  { %1817 = vtanh.f32 %v1103_v28 }
 0x314   :  { %v1361_v32 = vpack.c.bf16 %v1291_v29, %v1290_v30  ;;  %v946_v33 = vpop.f32.mrf.mxu3  ;;  %v1293_v43 = vadd.f32 0.5, %v1229_v35 }
 0x315   :  { %v947_v34 = vadd.f32 %v946_v33, %v2231_v8 }
 0x316   :  { %1393 = vst [vmem:[%s2427_s6 + $0xc8] sm:$0xff] %v1361_v32  ;;  %v1038_v36 = vpop.f32.mrf.mxu0 }
 0x317   :  { %v1816_v37 = vpop.eup %1815  ;;  %v1102_v38 = vmul.f32 0.5, %v947_v34  ;;  %v1039_v39 = vadd.f32 %v1038_v36, %v2226_v1 }
 0x318   :  { %v1228_v41 = vmul.f32 0.5, %v1816_v37 }
 0x319   :  { %1819 = vtanh.f32 %v1102_v38  ;;  %v1105_v42 = vmul.f32 0.5, %v1039_v39  ;;  %v1818_v62 = vpop.eup %1817 }
 0x31a   :  { %v1292_v44 = vadd.f32 0.5, %v1228_v41  ;;  %v1231_v47 = vmul.f32 0.5, %v1818_v62 }
 0x31b   :  { %1821 = vtanh.f32 %v1105_v42 }
 0x31c   :  { %v1362_v49 = vpack.c.bf16 %v1293_v43, %v1292_v44  ;;  %v949_v45 = vpop.f32.mrf.mxu3  ;;  %v1295_v55 = vadd.f32 0.5, %v1231_v47 }
 0x31d   :  { %v950_v46 = vadd.f32 %v949_v45, %v2231_v8 }
 0x31e   :  { %1394 = vst [vmem:[%s2427_s6 + $0xd0] sm:$0xff] %v1362_v49  ;;  %v1040_v48 = vpop.f32.mrf.mxu0 }
 0x31f   :  { %v1820_v50 = vpop.eup %1819  ;;  %v1104_v51 = vmul.f32 0.5, %v950_v46  ;;  %v1041_v52 = vadd.f32 %v1040_v48, %v2226_v1 }
 0x320   :  { %v1230_v53 = vmul.f32 0.5, %v1820_v50 }
 0x321   :  { %1823 = vtanh.f32 %v1104_v51  ;;  %v1107_v54 = vmul.f32 0.5, %v1041_v52  ;;  %v1822_v57 = vpop.eup %1821 }
 0x322   :  { %v1294_v56 = vadd.f32 0.5, %v1230_v53  ;;  %v1233_v61 = vmul.f32 0.5, %v1822_v57 }
 0x323   :  { %1825 = vtanh.f32 %v1107_v54 }
 0x324   :  { %v1363_v58 = vpack.c.bf16 %v1295_v55, %v1294_v56  ;;  %v951_v59 = vpop.f32.mrf.mxu3  ;;  %v1297_v3 = vadd.f32 0.5, %v1233_v61 }
 0x325   :  { %v952_v60 = vadd.f32 %v951_v59, %v2231_v8 }
 0x326   :  { %1395 = vst [vmem:[%s2427_s6 + $0xd8] sm:$0xff] %v1363_v58 }
 0x327   :  { %v1824_v63 = vpop.eup %1823  ;;  %v1106_v0 = vmul.f32 0.5, %v952_v60 }
 0x328   :  { %v1232_v2 = vmul.f32 0.5, %v1824_v63 }
 0x329   :  { %1827 = vtanh.f32 %v1106_v0  ;;  %v1826_v5 = vpop.eup %1825 }
 0x32a   :  { %v1296_v4 = vadd.f32 0.5, %v1232_v2  ;;  %v1235_v40 = vmul.f32 0.5, %v1826_v5 }
 0x32c   :  { %v1364_v6 = vpack.c.bf16 %v1297_v3, %v1296_v4  ;;  %v954_v7 = vpop.f32.mrf.mxu3  ;;  %v1043_v9 = vpop.f32.mrf.mxu2  ;;  %v1299_v16 = vadd.f32 0.5, %v1235_v40 }
 0x32d   :  { %v955_v10 = vadd.f32 %v954_v7, %v2231_v8  ;;  %v1044_v11 = vadd.f32 %v1043_v9, %v2226_v1 }
 0x32e   :  { %1396 = vst [vmem:[%s2427_s6 + $0xe0] sm:$0xff] %v1364_v6 }
 0x32f   :  { %v1828_v12 = vpop.eup %1827  ;;  %v1108_v13 = vmul.f32 0.5, %v955_v10  ;;  %v1109_v14 = vmul.f32 0.5, %v1044_v11 }
 0x330   :  { %v1234_v15 = vmul.f32 0.5, %v1828_v12 }
 0x331   :  { %1829 = vtanh.f32 %v1108_v13 }
 0x332   :  { %v1298_v17 = vadd.f32 0.5, %v1234_v15  ;;  %1831 = vtanh.f32 %v1109_v14 }
 0x334   :  { %v1365_v18 = vpack.c.bf16 %v1299_v16, %v1298_v17  ;;  %v956_v19 = vpop.f32.mrf.mxu3  ;;  %v1045_v20 = vpop.f32.mrf.mxu2 }
 0x335   :  { %v957_v21 = vadd.f32 %v956_v19, %v2231_v8  ;;  %v1046_v22 = vadd.f32 %v1045_v20, %v2226_v1 }
 0x336   :  { %1397 = vst [vmem:[%s2427_s6 + $0xe8] sm:$0xff] %v1365_v18 }
 0x337   :  { %v1830_v23 = vpop.eup %1829  ;;  %v1110_v24 = vmul.f32 0.5, %v957_v21  ;;  %v1111_v25 = vmul.f32 0.5, %v1046_v22 }
 0x338   :  { %v1832_v26 = vpop.eup %1831  ;;  %v1236_v27 = vmul.f32 0.5, %v1830_v23 }
 0x339   :  { %v1237_v28 = vmul.f32 0.5, %v1832_v26  ;;  %1833 = vtanh.f32 %v1110_v24 }
 0x33a   :  { %v1300_v29 = vadd.f32 0.5, %v1236_v27  ;;  %1835 = vtanh.f32 %v1111_v25 }
 0x33b   :  { %v1301_v30 = vadd.f32 0.5, %v1237_v28 }
 0x33d   :  { %v1366_v31 = vpack.c.bf16 %v1301_v30, %v1300_v29 }
 0x33f   :  { %v1834_v32 = vpop.eup %1833  ;;  %1398 = vst [vmem:[%s2427_s6 + $0xf0] sm:$0xff] %v1366_v31 }
 0x340   :  { %v1836_v1 = vpop.eup %1835  ;;  %v1238_v8 = vmul.f32 0.5, %v1834_v32 }
 0x341   :  { %v1239_v33 = vmul.f32 0.5, %v1836_v1 }
 0x342   :  { %v1302_v34 = vadd.f32 0.5, %v1238_v8 }
 0x343   :  { %v1303_v35 = vadd.f32 0.5, %v1239_v33 }
 0x345   :  { %v1367_v36 = vpack.c.bf16 %v1303_v35, %v1302_v34 }
 0x347   :  { %1399 = vst [vmem:[%s2427_s6 + $0xf8] sm:$0xff] %v1367_v36 }

</bundles_post_ra>
